<compile_context>
chip_gen: v5e
topology: v5e:2x2
jax: 0.10.0
libtpu: 0.0.40
codegen_flags: <defaults>
</compile_context>

<pallas_src>
import functools
import math

import jax
import jax.numpy as jnp
from jax.experimental import pallas as pl
from jax.experimental.pallas import tpu as pltpu

# ----------------------------- configuration --------------------------------
N = 2          # batch
L = 8          # sequence length
E = 32         # embed_size
H = 32         # hidden_size (== embed_size so residual connections type-check)
HEADS = 4
D_HEAD = H // HEADS
EPS = 1e-5     # torch.nn.LayerNorm default


# ------------------------------- kernel -------------------------------------
def _decoder_layer_kernel(n, l, heads,
                          y_ref, hx_ref, w12_ref, b12_ref, wm_ref, vecs_ref,
                          out_ref):
    nl = n * l
    h = hx_ref.shape[-1]
    d = h // heads
    ng = n * heads                       # score/PV batch groups

    # ---- load everything once (whole problem lives in a few vregs) ---------
    y = y_ref[...]                       # (nl, E)
    hx = hx_ref[...]                     # (nl, H)
    w1 = w12_ref[0]                      # (E, 3H)   self-attn QKV (Q pre-scaled)
    w2 = w12_ref[1]                      # (H, 3H)   cross-attn QKV (Q pre-scaled)
    b12 = b12_ref[...]                   # (2, 3H)
    b1 = b12[0:1]                        # (1, 3H)
    b2q = b12[1:2, :h]                   # (1, H)
    b2kv = b12[1:2, h:]                  # (1, 2H)
    wo1 = wm_ref[0]                      # (H, H)
    wo2 = wm_ref[1]                      # (H, H)
    wf = wm_ref[2]                       # (H, H)
    vecs = vecs_ref[...]                 # (9, H)
    bo1, g1, be1 = vecs[0:1], vecs[1:2], vecs[2:3]
    bo2, g2, be2 = vecs[3:4], vecs[4:5], vecs[5:6]
    bf, g3, be3 = vecs[6:7], vecs[7:8], vecs[8:9]

    def layer_norm(x, g, b):
        mu = jnp.mean(x, axis=-1, keepdims=True)
        xc = x - mu
        var = jnp.mean(xc * xc, axis=-1, keepdims=True)
        return xc * jax.lax.rsqrt(var + EPS) * g + b

    def to_heads(x2d):
        # (nl, h) row-major -> (heads*n, l, d) head-major groups.
        # Static lane slices + leading-dim reshape/concat only (layout-safe).
        return jnp.concatenate(
            [x2d[:, i * d:(i + 1) * d].reshape(n, l, d) for i in range(heads)],
            axis=0)

    def from_heads(o_hm):
        # (heads*n, l, d) -> (nl, h): inverse of to_heads (lane concat).
        return jnp.concatenate(
            [o_hm[i * n:(i + 1) * n].reshape(nl, d) for i in range(heads)],
            axis=-1)

    def attention(q2d, k2d, v2d, wo, bo, mask):
        # q2d/k2d/v2d: (nl, h), already biased; Q already scaled by 1/sqrt(d).
        q = to_heads(q2d)                # (ng, l, d)
        k = to_heads(k2d)
        v = to_heads(v2d)
        s = jax.lax.dot_general(         # (ng, l, l)
            q, k, (((2,), (2,)), ((0,), (0,))),
            preferred_element_type=jnp.float32)
        if mask is not None:
            s = jnp.where(mask, s, -1e9)
        s = s - jnp.max(s, axis=-1, keepdims=True)
        p = jnp.exp(s)
        p = p * pl.reciprocal(jnp.sum(p, axis=-1, keepdims=True), approx=True)
        o = jax.lax.dot_general(         # (ng, l, d)
            p, v, (((2,), (1,)), ((0,), (0,))),
            preferred_element_type=jnp.float32)
        ctx = from_heads(o)              # (nl, h)
        # Single lane-dense output projection.
        return jnp.dot(ctx, wo, preferred_element_type=jnp.float32) + bo

    # Causal (look-ahead) mask generated on-chip: True = attend.
    rows = jax.lax.broadcasted_iota(jnp.int32, (ng, l, l), 1)
    cols = jax.lax.broadcasted_iota(jnp.int32, (ng, l, l), 2)
    causal = rows >= cols

    # ---- 1) masked multi-head self-attention + residual + norm -------------
    qkv1 = jnp.dot(y, w1, preferred_element_type=jnp.float32) + b1     # (nl, 3H)
    a1 = attention(qkv1[:, :h], qkv1[:, h:2 * h], qkv1[:, 2 * h:],
                   wo1, bo1, causal)
    out1 = layer_norm(a1 + y, g1, be1)

    # ---- 2) encoder-decoder attention + residual + norm --------------------
    q2 = jnp.dot(out1, w2[:, :h], preferred_element_type=jnp.float32) + b2q
    kv2 = jnp.dot(hx, w2[:, h:], preferred_element_type=jnp.float32) + b2kv
    a2 = attention(q2, kv2[:, :h], kv2[:, h:], wo2, bo2, None)
    out2 = layer_norm(a2 + out1, g2, be2)

    # ---- 3) position-wise FFN (single Linear) + residual + norm ------------
    f = jnp.dot(out2, wf, preferred_element_type=jnp.float32) + bf
    out3 = layer_norm(f + out2, g3, be3)

    out_ref[...] = out3.astype(out_ref.dtype)


# ------------------------------- packing -------------------------------------
def pack_params(p, heads=HEADS):
    """Pack torch-style weights lane-dense. Call ONCE, off the hot path."""
    h = p["wo1"].shape[0]
    d = h // heads
    scale = 1.0 / math.sqrt(d)

    w1 = jnp.concatenate([p["wq1"] * scale, p["wk1"], p["wv1"]], axis=1)  # (E,3H)
    b1 = jnp.concatenate([p["bq1"] * scale, p["bk1"], p["bv1"]], axis=1)  # (1,3H)
    w2 = jnp.concatenate([p["wq2"] * scale, p["wk2"], p["wv2"]], axis=1)  # (H,3H)
    b2 = jnp.concatenate([p["bq2"] * scale, p["bk2"], p["bv2"]], axis=1)  # (1,3H)

    return {
        "w12": jnp.stack([w1, w2]),                       # (2, E, 3H)
        "b12": jnp.concatenate([b1, b2], axis=0),         # (2, 3H)
        "wm": jnp.stack([p["wo1"], p["wo2"], p["wf"]]),   # (3, H, H)
        "vecs": jnp.concatenate([p["bo1"], p["g1"], p["be1"],
                                 p["bo2"], p["g2"], p["be2"],
                                 p["bf"], p["g3"], p["be3"]], axis=0),  # (9, H)
    }


# ------------------------------- wrapper -------------------------------------
def decoder_layer(Y_ep, H_all_x, M, packed, heads=HEADS):
    # NOTE: M is accepted for API parity with the torch module. The dekorde
    # decoder always passes the causal look-ahead mask, which the kernel
    # regenerates on-chip (avoids DMA'ing a replicated (N, L, L) mask).
    # TODO(synk): arbitrary padding / non-causal masks are not honoured.
    del M
    n, l, e = Y_ep.shape
    h = H_all_x.shape[-1]
    assert e == h, "residual connections require embed_size == hidden_size"
    assert h % heads == 0
    nl = n * l

    # Batch folded into matmul rows; reshape is a free metadata change here.
    y2 = Y_ep.reshape(nl, e)
    hx2 = H_all_x.reshape(nl, h)
    w12, b12, wm, vecs = packed["w12"], packed["b12"], packed["wm"], packed["vecs"]

    kernel = functools.partial(_decoder_layer_kernel, n, l, heads)

    out2d = pl.pallas_call(
        kernel,
        out_shape=jax.ShapeDtypeStruct((nl, h), jnp.float32),
        # Single grid step on every generation: the whole layer is a few KB
        # and well under a microsecond; splitting only adds per-step pipeline
        # overhead and duplicates the parameter DMA.
        grid=(1,),
        in_specs=[
            pl.BlockSpec((nl, e), lambda i: (0, 0)),
            pl.BlockSpec((nl, h), lambda i: (0, 0)),
            pl.BlockSpec(w12.shape, lambda i: (0, 0, 0)),
            pl.BlockSpec(b12.shape, lambda i: (0, 0)),
            pl.BlockSpec(wm.shape, lambda i: (0, 0, 0)),
            pl.BlockSpec(vecs.shape, lambda i: (0, 0)),
        ],
        out_specs=pl.BlockSpec((nl, h), lambda i: (0, 0)),
        compiler_params=pltpu.CompilerParams(
            dimension_semantics=("arbitrary",)),
    )(y2, hx2, w12, b12, wm, vecs)

    return out2d.reshape(n, l, h)


# ----------------------------- pure-JAX reference ----------------------------
def decoder_layer_ref(Y_ep, H_all_x, M, p, heads=HEADS):
    def ln(x, g, b):
        mu = jnp.mean(x, axis=-1, keepdims=True)
        var = jnp.mean((x - mu) ** 2, axis=-1, keepdims=True)
        return (x - mu) / jnp.sqrt(var + EPS) * g + b

    def mha(xq, xk, xv, wq, bq, wk, bk, wv, bv, wo, bo, mask):
        n, l, _ = xq.shape
        d = wq.shape[1] // heads
        Q = (xq @ wq + bq).reshape(n, l, heads, d)
        K = (xk @ wk + bk).reshape(n, l, heads, d)
        V = (xv @ wv + bv).reshape(n, l, heads, d)
        S = jnp.einsum("nqhd,nkhd->nhqk", Q, K) / math.sqrt(d)
        if mask is not None:
            S = jnp.where(mask[:, None, :, :] == 0.0, -1e9, S)
        P = jax.nn.softmax(S, axis=-1)
        O = jnp.einsum("nhqk,nkhd->nqhd", P, V).reshape(n, l, heads * d)
        return O @ wo + bo

    out1 = ln(mha(Y_ep, Y_ep, Y_ep, p["wq1"], p["bq1"], p["wk1"], p["bk1"],
                  p["wv1"], p["bv1"], p["wo1"], p["bo1"], M) + Y_ep,
              p["g1"], p["be1"])
    out2 = ln(mha(out1, H_all_x, H_all_x, p["wq2"], p["bq2"], p["wk2"],
                  p["bk2"], p["wv2"], p["bv2"], p["wo2"], p["bo2"], None)
              + out1, p["g2"], p["be2"])
    out3 = ln(out2 @ p["wf"] + p["bf"] + out2, p["g3"], p["be3"])
    return out3


# --------------------------------- main --------------------------------------
def init_params(key):
    keys = jax.random.split(key, 16)
    k = iter(keys)

    def lin(kk, din, dout):
        return 0.05 * jax.random.normal(kk, (din, dout), jnp.float32)

    p = {
        # masked self-attention (E -> H)
        "wq1": lin(next(k), E, H), "bq1": jnp.zeros((1, H), jnp.float32),
        "wk1": lin(next(k), E, H), "bk1": jnp.zeros((1, H), jnp.float32),
        "wv1": lin(next(k), E, H), "bv1": jnp.zeros((1, H), jnp.float32),
        "wo1": lin(next(k), H, H), "bo1": jnp.zeros((1, H), jnp.float32),
        "g1": jnp.ones((1, H), jnp.float32), "be1": jnp.zeros((1, H), jnp.float32),
        # encoder-decoder attention (H -> H)
        "wq2": lin(next(k), H, H), "bq2": jnp.zeros((1, H), jnp.float32),
        "wk2": lin(next(k), H, H), "bk2": jnp.zeros((1, H), jnp.float32),
        "wv2": lin(next(k), H, H), "bv2": jnp.zeros((1, H), jnp.float32),
        "wo2": lin(next(k), H, H), "bo2": jnp.zeros((1, H), jnp.float32),
        "g2": jnp.ones((1, H), jnp.float32), "be2": jnp.zeros((1, H), jnp.float32),
        # ffn (H -> H) + final norm
        "wf": lin(next(k), H, H), "bf": jnp.zeros((1, H), jnp.float32),
        "g3": jnp.ones((1, H), jnp.float32), "be3": jnp.zeros((1, H), jnp.float32),
    }
    return p


if __name__ == "__main__":
    root = jax.random.PRNGKey(0)
    k_y, k_h, k_p = jax.random.split(root, 3)

    Y_ep = jax.random.normal(k_y, (N, L, E), jnp.float32)
    H_all_x = jax.random.normal(k_h, (N, L, H), jnp.float32)
    # causal mask: 1.0 = attend, 0.0 = masked (kernel regenerates it on-chip)
    M = jnp.tril(jnp.ones((L, L), jnp.float32))[None].repeat(N, axis=0)

    params = init_params(k_p)

    # Pack weights ONCE (hoisted off the per-call hot path), then jit the
    # forward so the in/out reshapes fuse with the pallas_call.
    packed = jax.tree_util.tree_map(jax.block_until_ready,
                                    pack_params(params, HEADS))
    fwd = jax.jit(lambda y, hx, m, pk: decoder_layer(y, hx, m, pk, heads=HEADS))

    out = jax.block_until_ready(fwd(Y_ep, H_all_x, M, packed))

    ref = jax.block_until_ready(decoder_layer_ref(Y_ep, H_all_x, M, params))
    assert out.shape == (N, L, H)
    # Tolerance accounts for the approximate-reciprocal softmax denominator.
    assert jnp.allclose(out, ref, atol=5e-3, rtol=5e-3), (
        f"max abs err {jnp.max(jnp.abs(out - ref))}")

    print("KERNEL_OK")
</pallas_src>

<mosaic_0001>
module attributes {stable_mosaic.version = 11 : i64} {
  func.func @_decoder_layer_kernel(%arg0: i32, %arg1: memref<16x32xf32, #tpu.memory_space<vmem>>, %arg2: memref<16x32xf32, #tpu.memory_space<vmem>>, %arg3: memref<2x32x96xf32, #tpu.memory_space<vmem>>, %arg4: memref<2x96xf32, #tpu.memory_space<vmem>>, %arg5: memref<3x32x32xf32, #tpu.memory_space<vmem>>, %arg6: memref<9x32xf32, #tpu.memory_space<vmem>>, %arg7: memref<16x32xf32, #tpu.memory_space<vmem>>) attributes {dimension_semantics = [#tpu.dimension_semantics<arbitrary>], iteration_bounds = array<i64: 1>, scalar_prefetch = 0 : i64, scratch_operands = 0 : i64, tpu.core_type = #tpu.core_type<tc>, window_params = [{pipeline_mode = #tpu.pipeline_mode<synchronous>, transform_indices = @transform_0, window_bounds = array<i64: 16, 32>}, {pipeline_mode = #tpu.pipeline_mode<synchronous>, transform_indices = @transform_1, window_bounds = array<i64: 16, 32>}, {pipeline_mode = #tpu.pipeline_mode<synchronous>, transform_indices = @transform_2, window_bounds = array<i64: 2, 32, 96>}, {pipeline_mode = #tpu.pipeline_mode<synchronous>, transform_indices = @transform_3, window_bounds = array<i64: 2, 96>}, {pipeline_mode = #tpu.pipeline_mode<synchronous>, transform_indices = @transform_4, window_bounds = array<i64: 3, 32, 32>}, {pipeline_mode = #tpu.pipeline_mode<synchronous>, transform_indices = @transform_5, window_bounds = array<i64: 9, 32>}, {pipeline_mode = #tpu.pipeline_mode<synchronous>, transform_indices = @transform_6, window_bounds = array<i64: 16, 32>}]} {
    %c0 = arith.constant 0 : index
    %c0_0 = arith.constant 0 : index
    %0 = vector.load %arg1[%c0, %c0_0] : memref<16x32xf32, #tpu.memory_space<vmem>>, vector<16x32xf32>
    %c0_1 = arith.constant 0 : index
    %c0_2 = arith.constant 0 : index
    %1 = vector.load %arg2[%c0_1, %c0_2] : memref<16x32xf32, #tpu.memory_space<vmem>>, vector<16x32xf32>
    %c0_3 = arith.constant 0 : index
    %c0_4 = arith.constant 0 : index
    %c0_5 = arith.constant 0 : index
    %2 = vector.load %arg3[%c0_3, %c0_4, %c0_5] : memref<2x32x96xf32, #tpu.memory_space<vmem>>, vector<1x32x96xf32>
    %3 = vector.shape_cast %2 : vector<1x32x96xf32> to vector<32x96xf32>
    %c1 = arith.constant 1 : index
    %c0_6 = arith.constant 0 : index
    %c0_7 = arith.constant 0 : index
    %4 = vector.load %arg3[%c1, %c0_6, %c0_7] : memref<2x32x96xf32, #tpu.memory_space<vmem>>, vector<1x32x96xf32>
    %5 = vector.shape_cast %4 : vector<1x32x96xf32> to vector<32x96xf32>
    %c0_8 = arith.constant 0 : index
    %c0_9 = arith.constant 0 : index
    %6 = vector.load %arg4[%c0_8, %c0_9] : memref<2x96xf32, #tpu.memory_space<vmem>>, vector<2x96xf32>
    %7 = vector.extract_strided_slice %6 {offsets = [0, 0], sizes = [1, 96], strides = [1, 1]} : vector<2x96xf32> to vector<1x96xf32>
    %8 = vector.extract_strided_slice %6 {offsets = [1, 0], sizes = [1, 32], strides = [1, 1]} : vector<2x96xf32> to vector<1x32xf32>
    %9 = vector.extract_strided_slice %6 {offsets = [1, 32], sizes = [1, 64], strides = [1, 1]} : vector<2x96xf32> to vector<1x64xf32>
    %c0_10 = arith.constant 0 : index
    %c0_11 = arith.constant 0 : index
    %c0_12 = arith.constant 0 : index
    %10 = vector.load %arg5[%c0_10, %c0_11, %c0_12] : memref<3x32x32xf32, #tpu.memory_space<vmem>>, vector<1x32x32xf32>
    %11 = vector.shape_cast %10 : vector<1x32x32xf32> to vector<32x32xf32>
    %c1_13 = arith.constant 1 : index
    %c0_14 = arith.constant 0 : index
    %c0_15 = arith.constant 0 : index
    %12 = vector.load %arg5[%c1_13, %c0_14, %c0_15] : memref<3x32x32xf32, #tpu.memory_space<vmem>>, vector<1x32x32xf32>
    %13 = vector.shape_cast %12 : vector<1x32x32xf32> to vector<32x32xf32>
    %c2 = arith.constant 2 : index
    %c0_16 = arith.constant 0 : index
    %c0_17 = arith.constant 0 : index
    %14 = vector.load %arg5[%c2, %c0_16, %c0_17] : memref<3x32x32xf32, #tpu.memory_space<vmem>>, vector<1x32x32xf32>
    %15 = vector.shape_cast %14 : vector<1x32x32xf32> to vector<32x32xf32>
    %c0_18 = arith.constant 0 : index
    %c0_19 = arith.constant 0 : index
    %16 = vector.load %arg6[%c0_18, %c0_19] : memref<9x32xf32, #tpu.memory_space<vmem>>, vector<9x32xf32>
    %17 = vector.extract_strided_slice %16 {offsets = [0, 0], sizes = [1, 32], strides = [1, 1]} : vector<9x32xf32> to vector<1x32xf32>
    %18 = vector.extract_strided_slice %16 {offsets = [1, 0], sizes = [1, 32], strides = [1, 1]} : vector<9x32xf32> to vector<1x32xf32>
    %19 = vector.extract_strided_slice %16 {offsets = [2, 0], sizes = [1, 32], strides = [1, 1]} : vector<9x32xf32> to vector<1x32xf32>
    %20 = vector.extract_strided_slice %16 {offsets = [3, 0], sizes = [1, 32], strides = [1, 1]} : vector<9x32xf32> to vector<1x32xf32>
    %21 = vector.extract_strided_slice %16 {offsets = [4, 0], sizes = [1, 32], strides = [1, 1]} : vector<9x32xf32> to vector<1x32xf32>
    %22 = vector.extract_strided_slice %16 {offsets = [5, 0], sizes = [1, 32], strides = [1, 1]} : vector<9x32xf32> to vector<1x32xf32>
    %23 = vector.extract_strided_slice %16 {offsets = [6, 0], sizes = [1, 32], strides = [1, 1]} : vector<9x32xf32> to vector<1x32xf32>
    %24 = vector.extract_strided_slice %16 {offsets = [7, 0], sizes = [1, 32], strides = [1, 1]} : vector<9x32xf32> to vector<1x32xf32>
    %25 = vector.extract_strided_slice %16 {offsets = [8, 0], sizes = [1, 32], strides = [1, 1]} : vector<9x32xf32> to vector<1x32xf32>
    %26 = tpu.iota {dimensions = array<i32: 1>} : vector<8x8x8xi32>
    %27 = tpu.iota {dimensions = array<i32: 2>} : vector<8x8x8xi32>
    %28 = arith.cmpi sge, %26, %27 : vector<8x8x8xi32>
    %cst = arith.constant dense<0.000000e+00> : vector<16x96xf32>
    %29 = tpu.matmul %0, %3, %cst {dimension_numbers = #tpu.dot_dimension_numbers<[1], [0], [0], [1], [0, 0, 1, 1], [], []>} : vector<16x32xf32>, vector<32x96xf32>, vector<16x96xf32> -> vector<16x96xf32>
    %30 = vector.broadcast %7 : vector<1x96xf32> to vector<16x96xf32>
    %31 = arith.addf %29, %30 : vector<16x96xf32>
    %32 = vector.extract_strided_slice %31 {offsets = [0, 0], sizes = [16, 32], strides = [1, 1]} : vector<16x96xf32> to vector<16x32xf32>
    %33 = vector.extract_strided_slice %31 {offsets = [0, 32], sizes = [16, 32], strides = [1, 1]} : vector<16x96xf32> to vector<16x32xf32>
    %34 = vector.extract_strided_slice %31 {offsets = [0, 64], sizes = [16, 32], strides = [1, 1]} : vector<16x96xf32> to vector<16x32xf32>
    %35 = vector.extract_strided_slice %32 {offsets = [0, 0], sizes = [16, 8], strides = [1, 1]} : vector<16x32xf32> to vector<16x8xf32>
    %36 = vector.shape_cast %35 : vector<16x8xf32> to vector<2x8x8xf32>
    %37 = vector.extract_strided_slice %32 {offsets = [0, 8], sizes = [16, 8], strides = [1, 1]} : vector<16x32xf32> to vector<16x8xf32>
    %38 = vector.shape_cast %37 : vector<16x8xf32> to vector<2x8x8xf32>
    %39 = vector.extract_strided_slice %32 {offsets = [0, 16], sizes = [16, 8], strides = [1, 1]} : vector<16x32xf32> to vector<16x8xf32>
    %40 = vector.shape_cast %39 : vector<16x8xf32> to vector<2x8x8xf32>
    %41 = vector.extract_strided_slice %32 {offsets = [0, 24], sizes = [16, 8], strides = [1, 1]} : vector<16x32xf32> to vector<16x8xf32>
    %42 = vector.shape_cast %41 : vector<16x8xf32> to vector<2x8x8xf32>
    %43 = tpu.concatenate %36, %38, %40, %42 in 0 : vector<2x8x8xf32>, vector<2x8x8xf32>, vector<2x8x8xf32>, vector<2x8x8xf32> -> vector<8x8x8xf32>
    %44 = vector.extract_strided_slice %33 {offsets = [0, 0], sizes = [16, 8], strides = [1, 1]} : vector<16x32xf32> to vector<16x8xf32>
    %45 = vector.shape_cast %44 : vector<16x8xf32> to vector<2x8x8xf32>
    %46 = vector.extract_strided_slice %33 {offsets = [0, 8], sizes = [16, 8], strides = [1, 1]} : vector<16x32xf32> to vector<16x8xf32>
    %47 = vector.shape_cast %46 : vector<16x8xf32> to vector<2x8x8xf32>
    %48 = vector.extract_strided_slice %33 {offsets = [0, 16], sizes = [16, 8], strides = [1, 1]} : vector<16x32xf32> to vector<16x8xf32>
    %49 = vector.shape_cast %48 : vector<16x8xf32> to vector<2x8x8xf32>
    %50 = vector.extract_strided_slice %33 {offsets = [0, 24], sizes = [16, 8], strides = [1, 1]} : vector<16x32xf32> to vector<16x8xf32>
    %51 = vector.shape_cast %50 : vector<16x8xf32> to vector<2x8x8xf32>
    %52 = tpu.concatenate %45, %47, %49, %51 in 0 : vector<2x8x8xf32>, vector<2x8x8xf32>, vector<2x8x8xf32>, vector<2x8x8xf32> -> vector<8x8x8xf32>
    %53 = vector.extract_strided_slice %34 {offsets = [0, 0], sizes = [16, 8], strides = [1, 1]} : vector<16x32xf32> to vector<16x8xf32>
    %54 = vector.shape_cast %53 : vector<16x8xf32> to vector<2x8x8xf32>
    %55 = vector.extract_strided_slice %34 {offsets = [0, 8], sizes = [16, 8], strides = [1, 1]} : vector<16x32xf32> to vector<16x8xf32>
    %56 = vector.shape_cast %55 : vector<16x8xf32> to vector<2x8x8xf32>
    %57 = vector.extract_strided_slice %34 {offsets = [0, 16], sizes = [16, 8], strides = [1, 1]} : vector<16x32xf32> to vector<16x8xf32>
    %58 = vector.shape_cast %57 : vector<16x8xf32> to vector<2x8x8xf32>
    %59 = vector.extract_strided_slice %34 {offsets = [0, 24], sizes = [16, 8], strides = [1, 1]} : vector<16x32xf32> to vector<16x8xf32>
    %60 = vector.shape_cast %59 : vector<16x8xf32> to vector<2x8x8xf32>
    %61 = tpu.concatenate %54, %56, %58, %60 in 0 : vector<2x8x8xf32>, vector<2x8x8xf32>, vector<2x8x8xf32>, vector<2x8x8xf32> -> vector<8x8x8xf32>
    %cst_20 = arith.constant dense<0.000000e+00> : vector<8x8x8xf32>
    %62 = tpu.matmul %43, %52, %cst_20 {dimension_numbers = #tpu.dot_dimension_numbers<[2], [2], [1], [1], [0, 0, 0, 1, 1, 1], [0], [0]>} : vector<8x8x8xf32>, vector<8x8x8xf32>, vector<8x8x8xf32> -> vector<8x8x8xf32>
    %cst_21 = arith.constant -1.000000e+09 : f32
    %63 = vector.broadcast %cst_21 : f32 to vector<8x8x8xf32>
    %64 = arith.select %28, %62, %63 : vector<8x8x8xi1>, vector<8x8x8xf32>
    %cst_22 = arith.constant dense<0xFF800000> : vector<8x8xf32>
    %65 = vector.multi_reduction <maximumf>, %64, %cst_22 [2] : vector<8x8x8xf32> to vector<8x8xf32>
    %66 = vector.shape_cast %65 : vector<8x8xf32> to vector<8x8x1xf32>
    %67 = vector.broadcast %66 : vector<8x8x1xf32> to vector<8x8x8xf32>
    %68 = arith.subf %64, %67 : vector<8x8x8xf32>
    %69 = math.exp %68 : vector<8x8x8xf32>
    %cst_23 = arith.constant dense<0.000000e+00> : vector<8x8xf32>
    %70 = vector.multi_reduction <add>, %69, %cst_23 [2] : vector<8x8x8xf32> to vector<8x8xf32>
    %71 = vector.shape_cast %70 : vector<8x8xf32> to vector<8x8x1xf32>
    %72 = tpu.reciprocal %71 {approx = true} : vector<8x8x1xf32> -> vector<8x8x1xf32>
    %73 = vector.broadcast %72 : vector<8x8x1xf32> to vector<8x8x8xf32>
    %74 = arith.mulf %69, %73 : vector<8x8x8xf32>
    %cst_24 = arith.constant dense<0.000000e+00> : vector<8x8x8xf32>
    %75 = tpu.matmul %74, %61, %cst_24 {dimension_numbers = #tpu.dot_dimension_numbers<[2], [1], [1], [2], [0, 0, 0, 1, 1, 2], [0], [0]>} : vector<8x8x8xf32>, vector<8x8x8xf32>, vector<8x8x8xf32> -> vector<8x8x8xf32>
    %76 = vector.extract_strided_slice %75 {offsets = [0, 0, 0], sizes = [2, 8, 8], strides = [1, 1, 1]} : vector<8x8x8xf32> to vector<2x8x8xf32>
    %77 = vector.shape_cast %76 : vector<2x8x8xf32> to vector<16x8xf32>
    %78 = vector.extract_strided_slice %75 {offsets = [2, 0, 0], sizes = [2, 8, 8], strides = [1, 1, 1]} : vector<8x8x8xf32> to vector<2x8x8xf32>
    %79 = vector.shape_cast %78 : vector<2x8x8xf32> to vector<16x8xf32>
    %80 = vector.extract_strided_slice %75 {offsets = [4, 0, 0], sizes = [2, 8, 8], strides = [1, 1, 1]} : vector<8x8x8xf32> to vector<2x8x8xf32>
    %81 = vector.shape_cast %80 : vector<2x8x8xf32> to vector<16x8xf32>
    %82 = vector.extract_strided_slice %75 {offsets = [6, 0, 0], sizes = [2, 8, 8], strides = [1, 1, 1]} : vector<8x8x8xf32> to vector<2x8x8xf32>
    %83 = vector.shape_cast %82 : vector<2x8x8xf32> to vector<16x8xf32>
    %84 = tpu.concatenate %77, %79, %81, %83 in 1 : vector<16x8xf32>, vector<16x8xf32>, vector<16x8xf32>, vector<16x8xf32> -> vector<16x32xf32>
    %cst_25 = arith.constant dense<0.000000e+00> : vector<16x32xf32>
    %85 = tpu.matmul %84, %11, %cst_25 {dimension_numbers = #tpu.dot_dimension_numbers<[1], [0], [0], [1], [0, 0, 1, 1], [], []>} : vector<16x32xf32>, vector<32x32xf32>, vector<16x32xf32> -> vector<16x32xf32>
    %86 = vector.broadcast %17 : vector<1x32xf32> to vector<16x32xf32>
    %87 = arith.addf %85, %86 : vector<16x32xf32>
    %88 = arith.addf %87, %0 : vector<16x32xf32>
    %cst_26 = arith.constant dense<0.000000e+00> : vector<16xf32>
    %89 = vector.multi_reduction <add>, %88, %cst_26 [1] : vector<16x32xf32> to vector<16xf32>
    %90 = vector.shape_cast %89 : vector<16xf32> to vector<16x1xf32>
    %cst_27 = arith.constant 3.200000e+01 : f32
    %91 = vector.broadcast %cst_27 : f32 to vector<16x1xf32>
    %92 = arith.divf %90, %91 : vector<16x1xf32>
    %93 = vector.broadcast %92 : vector<16x1xf32> to vector<16x32xf32>
    %94 = arith.subf %88, %93 : vector<16x32xf32>
    %95 = arith.mulf %94, %94 : vector<16x32xf32>
    %cst_28 = arith.constant dense<0.000000e+00> : vector<16xf32>
    %96 = vector.multi_reduction <add>, %95, %cst_28 [1] : vector<16x32xf32> to vector<16xf32>
    %97 = vector.shape_cast %96 : vector<16xf32> to vector<16x1xf32>
    %cst_29 = arith.constant 3.200000e+01 : f32
    %98 = vector.broadcast %cst_29 : f32 to vector<16x1xf32>
    %99 = arith.divf %97, %98 : vector<16x1xf32>
    %cst_30 = arith.constant 9.99999974E-6 : f32
    %100 = vector.broadcast %cst_30 : f32 to vector<16x1xf32>
    %101 = arith.addf %99, %100 : vector<16x1xf32>
    %102 = math.rsqrt %101 : vector<16x1xf32>
    %103 = vector.broadcast %102 : vector<16x1xf32> to vector<16x32xf32>
    %104 = arith.mulf %94, %103 : vector<16x32xf32>
    %105 = vector.broadcast %18 : vector<1x32xf32> to vector<16x32xf32>
    %106 = arith.mulf %104, %105 : vector<16x32xf32>
    %107 = vector.broadcast %19 : vector<1x32xf32> to vector<16x32xf32>
    %108 = arith.addf %106, %107 : vector<16x32xf32>
    %109 = vector.extract_strided_slice %5 {offsets = [0, 0], sizes = [32, 32], strides = [1, 1]} : vector<32x96xf32> to vector<32x32xf32>
    %cst_31 = arith.constant dense<0.000000e+00> : vector<16x32xf32>
    %110 = tpu.matmul %108, %109, %cst_31 {dimension_numbers = #tpu.dot_dimension_numbers<[1], [0], [0], [1], [0, 0, 1, 1], [], []>} : vector<16x32xf32>, vector<32x32xf32>, vector<16x32xf32> -> vector<16x32xf32>
    %111 = vector.broadcast %8 : vector<1x32xf32> to vector<16x32xf32>
    %112 = arith.addf %110, %111 : vector<16x32xf32>
    %113 = vector.extract_strided_slice %5 {offsets = [0, 32], sizes = [32, 64], strides = [1, 1]} : vector<32x96xf32> to vector<32x64xf32>
    %cst_32 = arith.constant dense<0.000000e+00> : vector<16x64xf32>
    %114 = tpu.matmul %1, %113, %cst_32 {dimension_numbers = #tpu.dot_dimension_numbers<[1], [0], [0], [1], [0, 0, 1, 1], [], []>} : vector<16x32xf32>, vector<32x64xf32>, vector<16x64xf32> -> vector<16x64xf32>
    %115 = vector.broadcast %9 : vector<1x64xf32> to vector<16x64xf32>
    %116 = arith.addf %114, %115 : vector<16x64xf32>
    %117 = vector.extract_strided_slice %116 {offsets = [0, 0], sizes = [16, 32], strides = [1, 1]} : vector<16x64xf32> to vector<16x32xf32>
    %118 = vector.extract_strided_slice %116 {offsets = [0, 32], sizes = [16, 32], strides = [1, 1]} : vector<16x64xf32> to vector<16x32xf32>
    %119 = vector.extract_strided_slice %112 {offsets = [0, 0], sizes = [16, 8], strides = [1, 1]} : vector<16x32xf32> to vector<16x8xf32>
    %120 = vector.shape_cast %119 : vector<16x8xf32> to vector<2x8x8xf32>
    %121 = vector.extract_strided_slice %112 {offsets = [0, 8], sizes = [16, 8], strides = [1, 1]} : vector<16x32xf32> to vector<16x8xf32>
    %122 = vector.shape_cast %121 : vector<16x8xf32> to vector<2x8x8xf32>
    %123 = vector.extract_strided_slice %112 {offsets = [0, 16], sizes = [16, 8], strides = [1, 1]} : vector<16x32xf32> to vector<16x8xf32>
    %124 = vector.shape_cast %123 : vector<16x8xf32> to vector<2x8x8xf32>
    %125 = vector.extract_strided_slice %112 {offsets = [0, 24], sizes = [16, 8], strides = [1, 1]} : vector<16x32xf32> to vector<16x8xf32>
    %126 = vector.shape_cast %125 : vector<16x8xf32> to vector<2x8x8xf32>
    %127 = tpu.concatenate %120, %122, %124, %126 in 0 : vector<2x8x8xf32>, vector<2x8x8xf32>, vector<2x8x8xf32>, vector<2x8x8xf32> -> vector<8x8x8xf32>
    %128 = vector.extract_strided_slice %117 {offsets = [0, 0], sizes = [16, 8], strides = [1, 1]} : vector<16x32xf32> to vector<16x8xf32>
    %129 = vector.shape_cast %128 : vector<16x8xf32> to vector<2x8x8xf32>
    %130 = vector.extract_strided_slice %117 {offsets = [0, 8], sizes = [16, 8], strides = [1, 1]} : vector<16x32xf32> to vector<16x8xf32>
    %131 = vector.shape_cast %130 : vector<16x8xf32> to vector<2x8x8xf32>
    %132 = vector.extract_strided_slice %117 {offsets = [0, 16], sizes = [16, 8], strides = [1, 1]} : vector<16x32xf32> to vector<16x8xf32>
    %133 = vector.shape_cast %132 : vector<16x8xf32> to vector<2x8x8xf32>
    %134 = vector.extract_strided_slice %117 {offsets = [0, 24], sizes = [16, 8], strides = [1, 1]} : vector<16x32xf32> to vector<16x8xf32>
    %135 = vector.shape_cast %134 : vector<16x8xf32> to vector<2x8x8xf32>
    %136 = tpu.concatenate %129, %131, %133, %135 in 0 : vector<2x8x8xf32>, vector<2x8x8xf32>, vector<2x8x8xf32>, vector<2x8x8xf32> -> vector<8x8x8xf32>
    %137 = vector.extract_strided_slice %118 {offsets = [0, 0], sizes = [16, 8], strides = [1, 1]} : vector<16x32xf32> to vector<16x8xf32>
    %138 = vector.shape_cast %137 : vector<16x8xf32> to vector<2x8x8xf32>
    %139 = vector.extract_strided_slice %118 {offsets = [0, 8], sizes = [16, 8], strides = [1, 1]} : vector<16x32xf32> to vector<16x8xf32>
    %140 = vector.shape_cast %139 : vector<16x8xf32> to vector<2x8x8xf32>
    %141 = vector.extract_strided_slice %118 {offsets = [0, 16], sizes = [16, 8], strides = [1, 1]} : vector<16x32xf32> to vector<16x8xf32>
    %142 = vector.shape_cast %141 : vector<16x8xf32> to vector<2x8x8xf32>
    %143 = vector.extract_strided_slice %118 {offsets = [0, 24], sizes = [16, 8], strides = [1, 1]} : vector<16x32xf32> to vector<16x8xf32>
    %144 = vector.shape_cast %143 : vector<16x8xf32> to vector<2x8x8xf32>
    %145 = tpu.concatenate %138, %140, %142, %144 in 0 : vector<2x8x8xf32>, vector<2x8x8xf32>, vector<2x8x8xf32>, vector<2x8x8xf32> -> vector<8x8x8xf32>
    %cst_33 = arith.constant dense<0.000000e+00> : vector<8x8x8xf32>
    %146 = tpu.matmul %127, %136, %cst_33 {dimension_numbers = #tpu.dot_dimension_numbers<[2], [2], [1], [1], [0, 0, 0, 1, 1, 1], [0], [0]>} : vector<8x8x8xf32>, vector<8x8x8xf32>, vector<8x8x8xf32> -> vector<8x8x8xf32>
    %cst_34 = arith.constant dense<0xFF800000> : vector<8x8xf32>
    %147 = vector.multi_reduction <maximumf>, %146, %cst_34 [2] : vector<8x8x8xf32> to vector<8x8xf32>
    %148 = vector.shape_cast %147 : vector<8x8xf32> to vector<8x8x1xf32>
    %149 = vector.broadcast %148 : vector<8x8x1xf32> to vector<8x8x8xf32>
    %150 = arith.subf %146, %149 : vector<8x8x8xf32>
    %151 = math.exp %150 : vector<8x8x8xf32>
    %cst_35 = arith.constant dense<0.000000e+00> : vector<8x8xf32>
    %152 = vector.multi_reduction <add>, %151, %cst_35 [2] : vector<8x8x8xf32> to vector<8x8xf32>
    %153 = vector.shape_cast %152 : vector<8x8xf32> to vector<8x8x1xf32>
    %154 = tpu.reciprocal %153 {approx = true} : vector<8x8x1xf32> -> vector<8x8x1xf32>
    %155 = vector.broadcast %154 : vector<8x8x1xf32> to vector<8x8x8xf32>
    %156 = arith.mulf %151, %155 : vector<8x8x8xf32>
    %cst_36 = arith.constant dense<0.000000e+00> : vector<8x8x8xf32>
    %157 = tpu.matmul %156, %145, %cst_36 {dimension_numbers = #tpu.dot_dimension_numbers<[2], [1], [1], [2], [0, 0, 0, 1, 1, 2], [0], [0]>} : vector<8x8x8xf32>, vector<8x8x8xf32>, vector<8x8x8xf32> -> vector<8x8x8xf32>
    %158 = vector.extract_strided_slice %157 {offsets = [0, 0, 0], sizes = [2, 8, 8], strides = [1, 1, 1]} : vector<8x8x8xf32> to vector<2x8x8xf32>
    %159 = vector.shape_cast %158 : vector<2x8x8xf32> to vector<16x8xf32>
    %160 = vector.extract_strided_slice %157 {offsets = [2, 0, 0], sizes = [2, 8, 8], strides = [1, 1, 1]} : vector<8x8x8xf32> to vector<2x8x8xf32>
    %161 = vector.shape_cast %160 : vector<2x8x8xf32> to vector<16x8xf32>
    %162 = vector.extract_strided_slice %157 {offsets = [4, 0, 0], sizes = [2, 8, 8], strides = [1, 1, 1]} : vector<8x8x8xf32> to vector<2x8x8xf32>
    %163 = vector.shape_cast %162 : vector<2x8x8xf32> to vector<16x8xf32>
    %164 = vector.extract_strided_slice %157 {offsets = [6, 0, 0], sizes = [2, 8, 8], strides = [1, 1, 1]} : vector<8x8x8xf32> to vector<2x8x8xf32>
    %165 = vector.shape_cast %164 : vector<2x8x8xf32> to vector<16x8xf32>
    %166 = tpu.concatenate %159, %161, %163, %165 in 1 : vector<16x8xf32>, vector<16x8xf32>, vector<16x8xf32>, vector<16x8xf32> -> vector<16x32xf32>
    %cst_37 = arith.constant dense<0.000000e+00> : vector<16x32xf32>
    %167 = tpu.matmul %166, %13, %cst_37 {dimension_numbers = #tpu.dot_dimension_numbers<[1], [0], [0], [1], [0, 0, 1, 1], [], []>} : vector<16x32xf32>, vector<32x32xf32>, vector<16x32xf32> -> vector<16x32xf32>
    %168 = vector.broadcast %20 : vector<1x32xf32> to vector<16x32xf32>
    %169 = arith.addf %167, %168 : vector<16x32xf32>
    %170 = arith.addf %169, %108 : vector<16x32xf32>
    %cst_38 = arith.constant dense<0.000000e+00> : vector<16xf32>
    %171 = vector.multi_reduction <add>, %170, %cst_38 [1] : vector<16x32xf32> to vector<16xf32>
    %172 = vector.shape_cast %171 : vector<16xf32> to vector<16x1xf32>
    %cst_39 = arith.constant 3.200000e+01 : f32
    %173 = vector.broadcast %cst_39 : f32 to vector<16x1xf32>
    %174 = arith.divf %172, %173 : vector<16x1xf32>
    %175 = vector.broadcast %174 : vector<16x1xf32> to vector<16x32xf32>
    %176 = arith.subf %170, %175 : vector<16x32xf32>
    %177 = arith.mulf %176, %176 : vector<16x32xf32>
    %cst_40 = arith.constant dense<0.000000e+00> : vector<16xf32>
    %178 = vector.multi_reduction <add>, %177, %cst_40 [1] : vector<16x32xf32> to vector<16xf32>
    %179 = vector.shape_cast %178 : vector<16xf32> to vector<16x1xf32>
    %cst_41 = arith.constant 3.200000e+01 : f32
    %180 = vector.broadcast %cst_41 : f32 to vector<16x1xf32>
    %181 = arith.divf %179, %180 : vector<16x1xf32>
    %cst_42 = arith.constant 9.99999974E-6 : f32
    %182 = vector.broadcast %cst_42 : f32 to vector<16x1xf32>
    %183 = arith.addf %181, %182 : vector<16x1xf32>
    %184 = math.rsqrt %183 : vector<16x1xf32>
    %185 = vector.broadcast %184 : vector<16x1xf32> to vector<16x32xf32>
    %186 = arith.mulf %176, %185 : vector<16x32xf32>
    %187 = vector.broadcast %21 : vector<1x32xf32> to vector<16x32xf32>
    %188 = arith.mulf %186, %187 : vector<16x32xf32>
    %189 = vector.broadcast %22 : vector<1x32xf32> to vector<16x32xf32>
    %190 = arith.addf %188, %189 : vector<16x32xf32>
    %cst_43 = arith.constant dense<0.000000e+00> : vector<16x32xf32>
    %191 = tpu.matmul %190, %15, %cst_43 {dimension_numbers = #tpu.dot_dimension_numbers<[1], [0], [0], [1], [0, 0, 1, 1], [], []>} : vector<16x32xf32>, vector<32x32xf32>, vector<16x32xf32> -> vector<16x32xf32>
    %192 = vector.broadcast %23 : vector<1x32xf32> to vector<16x32xf32>
    %193 = arith.addf %191, %192 : vector<16x32xf32>
    %194 = arith.addf %193, %190 : vector<16x32xf32>
    %cst_44 = arith.constant dense<0.000000e+00> : vector<16xf32>
    %195 = vector.multi_reduction <add>, %194, %cst_44 [1] : vector<16x32xf32> to vector<16xf32>
    %196 = vector.shape_cast %195 : vector<16xf32> to vector<16x1xf32>
    %cst_45 = arith.constant 3.200000e+01 : f32
    %197 = vector.broadcast %cst_45 : f32 to vector<16x1xf32>
    %198 = arith.divf %196, %197 : vector<16x1xf32>
    %199 = vector.broadcast %198 : vector<16x1xf32> to vector<16x32xf32>
    %200 = arith.subf %194, %199 : vector<16x32xf32>
    %201 = arith.mulf %200, %200 : vector<16x32xf32>
    %cst_46 = arith.constant dense<0.000000e+00> : vector<16xf32>
    %202 = vector.multi_reduction <add>, %201, %cst_46 [1] : vector<16x32xf32> to vector<16xf32>
    %203 = vector.shape_cast %202 : vector<16xf32> to vector<16x1xf32>
    %cst_47 = arith.constant 3.200000e+01 : f32
    %204 = vector.broadcast %cst_47 : f32 to vector<16x1xf32>
    %205 = arith.divf %203, %204 : vector<16x1xf32>
    %cst_48 = arith.constant 9.99999974E-6 : f32
    %206 = vector.broadcast %cst_48 : f32 to vector<16x1xf32>
    %207 = arith.addf %205, %206 : vector<16x1xf32>
    %208 = math.rsqrt %207 : vector<16x1xf32>
    %209 = vector.broadcast %208 : vector<16x1xf32> to vector<16x32xf32>
    %210 = arith.mulf %200, %209 : vector<16x32xf32>
    %211 = vector.broadcast %24 : vector<1x32xf32> to vector<16x32xf32>
    %212 = arith.mulf %210, %211 : vector<16x32xf32>
    %213 = vector.broadcast %25 : vector<1x32xf32> to vector<16x32xf32>
    %214 = arith.addf %212, %213 : vector<16x32xf32>
    %c0_49 = arith.constant 0 : index
    %c0_50 = arith.constant 0 : index
    %215 = vector.load %arg7[%c0_49, %c0_50] : memref<16x32xf32, #tpu.memory_space<vmem>>, vector<16x32xf32>
    tpu.vector_store %arg7[%c0_49, %c0_50], %214 {strides = array<i32>} : memref<16x32xf32, #tpu.memory_space<vmem>>, vector<16x32xf32>,
    return
  }
  func.func @transform_0(%arg0: i32) -> (i32, i32) {
    %c0_i32 = arith.constant 0 : i32
    %c0_i32_0 = arith.constant 0 : i32
    %c0_i32_1 = arith.constant 0 : i32
    return %c0_i32, %c0_i32_0 : i32, i32
  }
  func.func @transform_1(%arg0: i32) -> (i32, i32) {
    %c0_i32 = arith.constant 0 : i32
    %c0_i32_0 = arith.constant 0 : i32
    %c0_i32_1 = arith.constant 0 : i32
    return %c0_i32, %c0_i32_0 : i32, i32
  }
  func.func @transform_2(%arg0: i32) -> (i32, i32, i32) {
    %c0_i32 = arith.constant 0 : i32
    %c0_i32_0 = arith.constant 0 : i32
    %c0_i32_1 = arith.constant 0 : i32
    %c0_i32_2 = arith.constant 0 : i32
    return %c0_i32, %c0_i32_0, %c0_i32_1 : i32, i32, i32
  }
  func.func @transform_3(%arg0: i32) -> (i32, i32) {
    %c0_i32 = arith.constant 0 : i32
    %c0_i32_0 = arith.constant 0 : i32
    %c0_i32_1 = arith.constant 0 : i32
    return %c0_i32, %c0_i32_0 : i32, i32
  }
  func.func @transform_4(%arg0: i32) -> (i32, i32, i32) {
    %c0_i32 = arith.constant 0 : i32
    %c0_i32_0 = arith.constant 0 : i32
    %c0_i32_1 = arith.constant 0 : i32
    %c0_i32_2 = arith.constant 0 : i32
    return %c0_i32, %c0_i32_0, %c0_i32_1 : i32, i32, i32
  }
  func.func @transform_5(%arg0: i32) -> (i32, i32) {
    %c0_i32 = arith.constant 0 : i32
    %c0_i32_0 = arith.constant 0 : i32
    %c0_i32_1 = arith.constant 0 : i32
    return %c0_i32, %c0_i32_0 : i32, i32
  }
  func.func @transform_6(%arg0: i32) -> (i32, i32) {
    %c0_i32 = arith.constant 0 : i32
    %c0_i32_0 = arith.constant 0 : i32
    %c0_i32_1 = arith.constant 0 : i32
    return %c0_i32, %c0_i32_0 : i32, i32
  }
}

</mosaic_0001>

<bundles_post_ra>
// kernel: _lambda_.1
= control target key start
LH: loop header
LB: loop body
LE: loop exit
PB: predicated region body
PF: predicated region fallthrough
CT: control target
= control target key end

     0   :  { %11 = vsyncpa [#allocation3], 0  ;;  %s2397_s0 = inlined_call_operand.hbm [shape: f32[16,32], index: 0, kind: input, shape index: {}]   ;;  %s2398_s1 = inlined_call_operand.hbm [shape: f32[16,32], index: 1, kind: input, shape index: {}]   ;;  %s2399_s2 = inlined_call_operand.hbm [shape: f32[2,32,96], index: 2, kind: input, shape index: {}]   ;;  %s2400_s3 = inlined_call_operand.vmem [shape: f32[2,96], index: 3, kind: input, shape index: {}]   ;;  %s2401_s4 = inlined_call_operand.hbm [shape: f32[3,32,32], index: 4, kind: input, shape index: {}]   ;;  %s2402_s5 = inlined_call_operand.hbm [shape: f32[9,32], index: 5, kind: input, shape index: {}]   ;;  %s2403_s6 = inlined_call_operand.hbm [shape: f32[16,32], index: 6, kind: output, shape index: {}]  }
   0x1   :  { %12 = vsyncpa [#allocation6], 0 }
   0x2   :  { %13 = vsyncpa [#allocation9], 0 }
   0x3   :  { %14 = vsyncpa [#allocation4], 0  ;;  %s32_s23 = sshll.u32 %s2398_s1, 4  ;;  %s1975_s24 = smov [#allocation5]   ;;  %s33_s23 = int_to_ptr.hbm [resolvable:$true] %s32_s23 }
   0x4   :  { %s34_s25 = sshll.u32 %s1975_s24, 4  ;;  %s60_s28 = sshll.u32 %s2401_s4, 4  ;;  %s35_s25 = int_to_ptr.vmem [resolvable:$true] %s34_s25  ;;  %s61_s28 = int_to_ptr.hbm [resolvable:$true] %s60_s28 }
   0x5   :  { %s1976_s29 = smov 128   ;;  %s1977_s30 = smov 8  }
   0x6   :  { %40 = dma.hbm_to_vmem [thread:$0]  %s33_s23, 256, %s35_s25, [#allocation6], %s1976_s29, %s1976_s29, %s1977_s30  }
   0x7   :  { %s1978_s7 = smov [#allocation8]   ;;  %s19_s1 = sshll.u32 %s2397_s0, 4  ;;  %s20_s1 = int_to_ptr.hbm [resolvable:$true] %s19_s1 }
   0x8   :  { %s62_s8 = sshll.u32 %s1978_s7, 4  ;;  %s45_s12 = sshll.u32 %s2399_s2, 4  ;;  %s63_s8 = int_to_ptr.vmem [resolvable:$true] %s62_s8  ;;  %s46_s12 = int_to_ptr.hbm [resolvable:$true] %s45_s12 }
   0x9   :  { %68 = dma.hbm_to_vmem [thread:$0]  %s61_s28, 1536, %s63_s8, [#allocation9], %s1976_s29, %s1976_s29, %s1977_s30  }
   0xa   :  { %s1979_s13 = smov [#allocation2]   ;;  %s1980_s15 = smov [#allocation7]  }
   0xb   :  { %s21_s14 = sshll.u32 %s1979_s13, 4  ;;  %s47_s0 = sshll.u32 %s1980_s15, 4  ;;  %s22_s14 = int_to_ptr.vmem [resolvable:$true] %s21_s14  ;;  %s48_s0 = int_to_ptr.vmem [resolvable:$true] %s47_s0 }
   0xc   :  { %27 = dma.hbm_to_vmem [thread:$0]  %s20_s1, 256, %s22_s14, [#allocation3], %s1976_s29, %s1976_s29, %s1977_s30  }
   0xd   :  { %s73_s18 = sshll.u32 %s2402_s5, 4  ;;  %s1981_s2 = smov [#allocation10]   ;;  %s74_s18 = int_to_ptr.hbm [resolvable:$true] %s73_s18 }
   0xe   :  { %53 = dma.hbm_to_vmem [thread:$0]  %s46_s12, 1024, %s48_s0, [#allocation6], %s1976_s29, %s1976_s29, %s1977_s30  }
   0xf   :  { %s75_s19 = sshll.u32 %s1981_s2, 4  ;;  %s76_s19 = int_to_ptr.vmem [resolvable:$true] %s75_s19 }
  0x10   :  { %81 = dma.hbm_to_vmem [thread:$0]  %s74_s18, 256, %s76_s19, [#allocation9], %s1976_s29, %s1976_s29, %s1977_s30  }
  0x11   :  { %1967 = dma.done.wait [#allocation3], 256  }
  0x12   :  { %1968 = vsyncadd [#allocation3], 4294967040 }
  0x13   :  { %1969 = dma.done.wait [#allocation6], 1280  }
  0x14   :  { %1970 = vsyncadd [#allocation6], 4294966016 }
  0x15   :  { %1971 = dma.done.wait [#allocation9], 1792  }
  0x16   :  { %1972 = vsyncadd [#allocation9], 4294965504  ;;  %v109_v0 = vld [vmem:[#allocation7 + $0x18] sm:$0xff]  ;;  %v108_v1 = vld [vmem:[#allocation7 + $0x10] sm:$0xff]  ;;  %vm138_vm0 = vcmask 261120   ;;  %s1982_s21 = smov 120   ;;  %v132_v26 = vlaneseq }
  0x17   :  { %157 = vmatpush.msra.mxu0 %v109_v0  ;;  %v107_v2 = vld [vmem:[#allocation7 + $0x8] sm:$0xff]  ;;  %v106_v3 = vld [vmem:[#allocation7] sm:$0xff]  ;;  %s1983_s22 = smov 104   ;;  %s1985_s23 = smov 96   ;;  %vm184_vm1 = vcmask 64512   ;;  %vm721_vm3 = vcmask 130048  }
  0x18   :  { %v2056_v4 = vld [vmem:[#allocation2] sm:$0xff]  ;;  %v2060_v5 = vld [vmem:[#allocation2 + $0x8] sm:$0xff]  ;;  %v133_v27 = vshrl.u32 %v132_v26, 7  ;;  %v135_v28 = vand.u32 127, %v132_v26  ;;  %s1986_s24 = smov 64   ;;  %s1987_s25 = smov 24  }
  0x19   :  { %158 = vmatpush.msra.mxu0 %v108_v1  ;;  %v2067_v6 = vld [vmem:[%s2400_s3] sm:$0x3]  ;;  %s1984_s3 = smov 112   ;;  %s1988_s26 = smov 16   ;;  %vm724_vm4 = vcmask 195584  }
  0x1a   :  { %v137_v7 = vperm.slane %v2067_v6, 0  ;;  %vm2138_vm2 = vcmp.ge.s32.totalorder %v133_v27, %v135_v28  ;;  %s1990_s27 = smov [#allocation11]   ;;  %s1613_s9 = sshll.u32 %s2403_s6, 4  ;;  %s1614_s9 = int_to_ptr.hbm [resolvable:$true] %s1613_s9 }
  0x1b   :  { %159 = vmatpush.msra.mxu0 %v107_v2  ;;  %s1611_s28 = sshll.u32 %s1990_s27, 4  ;;  %s1612_s28 = int_to_ptr.vmem [resolvable:$true] %s1611_s28 }
  0x1d   :  { %160 = vmatpush.msra.mxu0 %v106_v3 }
  0x1e   :  { %1628 = vmatmul.msk.f32.vlgmr.msra.gmra.mxu0 %vm138_vm0, %v2056_v4 }
  0x26   :  { %1629 = vmatmul.msk.f32.gmra.mxu0 %vm138_vm0, %v2060_v5 }
  0x9b   :  { %v162_v8 = vpop.f32.mrf.mxu0 }
  0x9c   :  { %v2070_v9 = vadd.f32 %v162_v8, %v137_v7 }
  0x9e   :  { %170 = vrot.lane.b32.xlu0 %v2070_v9, %s1982_s21 }
  0xa3   :  { %v165_v10 = vpop.f32.mrf.mxu0 }
  0xa4   :  { %v2074_v11 = vadd.f32 %v165_v10, %v137_v7 }
  0xa6   :  { %180 = vrot.lane.b32.xlu2 %v2074_v11, %s1983_s22  ;;  %172 = vrot.lane.b32.xlu1 %v2074_v11, %s1982_s21 }
  0xa7   :  { %174 = vrot.lane.b32.xlu0 %v2070_v9, %s1984_s3 }
  0xae   :  { %176 = vrot.lane.b32.xlu2 %v2074_v11, %s1984_s3  ;;  %178 = vrot.lane.b32.xlu1 %v2070_v9, %s1983_s22 }
  0xaf   :  { %182 = vrot.lane.b32.xlu0 %v2070_v9, %s1985_s23 }
 0x100   :  { %v2100_v15 = vpop.permute.xlu2 %180 }
 0x108   :  { %v2113_v18 = vpop.permute.xlu2 %176 }
 0x110   :  { %v2088_v12 = vpop.permute.xlu0 %170 }
 0x111   :  { %235 = vrot.lane.b32.xlu1 %v2088_v12, %s1985_s23  ;;  %v1704_v59 = vpack.i.bf16 %v2088_v12, %v2070_v9 }
 0x118   :  { %v2092_v13 = vpop.permute.xlu1 %172 }
 0x119   :  { %v2094_v14 = vpop.permute.xlu0 %174  ;;  %261 = vrot.lane.b32.xlu0 %v2092_v13, %s1985_s23 }
 0x11a   :  { %287 = vrot.lane.b32.xlu2 %v2094_v14, %s1985_s23 }
 0x120   :  { %v2102_v16 = vpop.permute.xlu1 %178 }
 0x121   :  { %v183_v17 = vpop.permute.xlu0 %182  ;;  %209 = vrot.lane.b32.xlu0 %v2074_v11, %s1985_s23  ;;  %339 = vrot.lane.b32.xlu1 %v2102_v16, %s1985_s23 }
 0x122   :  { %365 = vrot.lane.b32.xlu2 %v2100_v15, %s1985_s23  ;;  %1630 = vmatpush.xpose.msk.msra.mxu3 %vm184_vm1, %v183_v17 }
 0x125   :  { %1631 = vmatmul.msk.f32.vlgmr.msra.gmra.mxu3 %vm184_vm1, %v2070_v9 }
 0x129   :  { %313 = vrot.lane.b32.xlu1 %v2113_v18, %s1985_s23 }
 0x174   :  { %v288_v19 = vpop.permute.xlu2 %287 }
 0x175   :  { %1638 = vmatpush.xpose.msk.msra.mxu2 %vm184_vm1, %v288_v19 }
 0x178   :  { %1639 = vmatmul.msk.f32.vlgmr.msra.gmra.mxu2 %vm184_vm1, %v2094_v14 }
 0x17c   :  { %v366_v20 = vpop.permute.xlu2 %365 }
 0x17d   :  { %1644 = vmatpush.xpose.msk.msrb.mxu2 %vm184_vm1, %v366_v20 }
 0x180   :  { %1645 = vmatmul.msk.f32.vlgmr.msrb.gmra.mxu2 %vm184_vm1, %v2100_v15 }
 0x183   :  { %v236_v21 = vpop.permute.xlu1 %235 }
 0x184   :  { %1634 = vmatpush.xpose.msk.msrb.mxu3 %vm184_vm1, %v236_v21 }
 0x187   :  { %1635 = vmatmul.msk.f32.vlgmr.msrb.gmra.mxu3 %vm184_vm1, %v2088_v12 }
 0x18b   :  { %v262_v22 = vpop.permute.xlu0 %261 }
 0x18c   :  { %1636 = vmatpush.xpose.msk.msra.mxu1 %vm184_vm1, %v262_v22 }
 0x18f   :  { %1637 = vmatmul.msk.f32.vlgmr.msra.gmra.mxu1 %vm184_vm1, %v2092_v13 }
 0x193   :  { %v340_v23 = vpop.permute.xlu1 %339  ;;  %v210_v24 = vpop.permute.xlu0 %209 }
 0x194   :  { %1632 = vmatpush.xpose.msk.msrb.mxu0 %vm184_vm1, %v210_v24  ;;  %1642 = vmatpush.xpose.msk.msrb.mxu1 %vm184_vm1, %v340_v23 }
 0x197   :  { %1633 = vmatmul.msk.f32.vlgmr.msrb.gmra.mxu0 %vm184_vm1, %v2074_v11  ;;  %1643 = vmatmul.msk.f32.vlgmr.msrb.gmra.mxu1 %vm184_vm1, %v2102_v16 }
 0x19b   :  { %v314_v25 = vpop.permute.xlu1 %313 }
 0x19c   :  { %1640 = vmatpush.xpose.msk.msra.mxu3 %vm184_vm1, %v314_v25 }
 0x19f   :  { %1641 = vmatmul.msk.f32.vlgmr.msra.gmra.mxu3 %vm184_vm1, %v2113_v18 }
 0x1a8   :  { %v206_v30 = vpop.f32.mrf.mxu3 }
 0x1a9   :  { %v391_v31 = vsel %vm2138_vm2, %v206_v30, -1e+09 }
 0x1aa   :  { %v399_v32 = vsel %vm184_vm1, %v391_v31, -inf }
 0x1ab   :  { %400 = vmax.xlane.f32.xlu2 %v399_v32 }
 0x1fb   :  { %v310_v33 = vpop.f32.mrf.mxu2 }
 0x1fc   :  { %v395_v34 = vsel %vm2138_vm2, %v310_v33, -1e+09 }
 0x1fd   :  { %v411_v35 = vsel %vm184_vm1, %v395_v34, -inf }
 0x1fe   :  { %412 = vmax.xlane.f32.xlu1 %v411_v35 }
 0x203   :  { %v388_v36 = vpop.f32.mrf.mxu2 }
 0x204   :  { %v398_v37 = vsel %vm2138_vm2, %v388_v36, -1e+09 }
 0x205   :  { %v420_v38 = vsel %vm184_vm1, %v398_v37, -inf }
 0x206   :  { %421 = vmax.xlane.f32.xlu1 %v420_v38 }
 0x20a   :  { %v258_v45 = vpop.f32.mrf.mxu3 }
 0x20b   :  { %v393_v46 = vsel %vm2138_vm2, %v258_v45, -1e+09 }
 0x20c   :  { %v284_v39 = vpop.f32.mrf.mxu1  ;;  %v405_v48 = vsel %vm184_vm1, %v393_v46, -inf }
 0x20d   :  { %v394_v40 = vsel %vm2138_vm2, %v284_v39, -1e+09 }
 0x20e   :  { %v408_v41 = vsel %vm184_vm1, %v394_v40, -inf }
 0x20f   :  { %409 = vmax.xlane.f32.xlu2 %v408_v41 }
 0x214   :  { %v232_v42 = vpop.f32.mrf.mxu0  ;;  %v362_v54 = vpop.f32.mrf.mxu1 }
 0x215   :  { %v392_v43 = vsel %vm2138_vm2, %v232_v42, -1e+09  ;;  %v397_v56 = vsel %vm2138_vm2, %v362_v54, -1e+09 }
 0x216   :  { %v402_v44 = vsel %vm184_vm1, %v392_v43, -inf  ;;  %v417_v58 = vsel %vm184_vm1, %v397_v56, -inf }
 0x217   :  { %403 = vmax.xlane.f32.xlu0 %v402_v44 }
 0x21e   :  { %v401_v47 = vpop.xlane.xlu2 %400 }
 0x21f   :  { %v423_v49 = vsub.f32 %v391_v31, %v401_v47  ;;  %406 = vmax.xlane.f32.xlu0 %v405_v48 }
 0x221   :  { %v431_v50 = vmul.f32 1.442695, %v423_v49 }
 0x222   :  { %v336_v51 = vpop.f32.mrf.mxu3 }
 0x223   :  { %1745 = vpow2.f32 %v431_v50  ;;  %v2162_v52 = vsel %vm2138_vm2, %v336_v51, -1e+09 }
 0x224   :  { %v414_v53 = vsel %vm184_vm1, %v2162_v52, -inf }
 0x225   :  { %415 = vmax.xlane.f32.xlu2 %v414_v53 }
 0x229   :  { %v1746_v55 = vpop.eup %1745 }
 0x22a   :  { %v447_v57 = vsel %vm184_vm1, %v1746_v55, 0.0 }
 0x22b   :  { %448 = vadd.xlane.f32.xlu0 %v447_v57 }
 0x22d   :  { %418 = vmax.xlane.f32.xlu2 %v417_v58 }
 0x23f   :  { %1705 = vrot.lane.b32.xlu0 %v1704_v59, %s1986_s24 }
 0x271   :  { %v413_v60 = vpop.xlane.xlu1 %412 }
 0x272   :  { %v427_v61 = vsub.f32 %v395_v34, %v413_v60 }
 0x274   :  { %v439_v62 = vmul.f32 1.442695, %v427_v61 }
 0x276   :  { %1747 = vpow2.f32 %v439_v62 }
 0x279   :  { %v422_v63 = vpop.xlane.xlu1 %421 }
 0x27a   :  { %v430_v0 = vsub.f32 %v398_v37, %v422_v63  ;;  %v1714_v37 = vpack.i.bf16 %v2074_v11, %v2092_v13  ;;  %v1709_v11 = vpack.i.bf16 %v2102_v16, %v2094_v14 }
 0x27c   :  { %v2173_v1 = vpop.eup %1747  ;;  %v445_v2 = vmul.f32 1.442695, %v430_v0 }
 0x27d   :  { %v459_v3 = vsel %vm184_vm1, %v2173_v1, 0.0 }
 0x27e   :  { %1749 = vpow2.f32 %v445_v2  ;;  %460 = vadd.xlane.f32.xlu2 %v459_v3 }
 0x282   :  { %v410_v7 = vpop.xlane.xlu2 %409 }
 0x283   :  { %v426_v8 = vsub.f32 %v394_v40, %v410_v7 }
 0x284   :  { %v2177_v9 = vpop.eup %1749 }
 0x285   :  { %v437_v10 = vmul.f32 1.442695, %v426_v8  ;;  %v468_v12 = vsel %vm184_vm1, %v2177_v9, 0.0 }
 0x286   :  { %469 = vadd.xlane.f32.xlu0 %v468_v12 }
 0x287   :  { %1751 = vpow2.f32 %v437_v10 }
 0x28a   :  { %v404_v17 = vpop.xlane.xlu0 %403 }
 0x28b   :  { %v424_v19 = vsub.f32 %v392_v43, %v404_v17 }
 0x28d   :  { %v1752_v20 = vpop.eup %1751  ;;  %v433_v21 = vmul.f32 1.442695, %v424_v19 }
 0x28e   :  { %v456_v22 = vsel %vm184_vm1, %v1752_v20, 0.0 }
 0x28f   :  { %1753 = vpow2.f32 %v433_v21  ;;  %457 = vadd.xlane.f32.xlu2 %v456_v22 }
 0x292   :  { %v407_v23 = vpop.xlane.xlu0 %406 }
 0x293   :  { %v425_v24 = vsub.f32 %v393_v46, %v407_v23 }
 0x295   :  { %v1754_v25 = vpop.eup %1753  ;;  %v435_v26 = vmul.f32 1.442695, %v425_v24  ;;  %v119_v24 = vld [vmem:[#allocation8 + $0x18] sm:$0xff] }
 0x296   :  { %v450_v27 = vsel %vm184_vm1, %v1754_v25, 0.0 }
 0x297   :  { %1755 = vpow2.f32 %v435_v26  ;;  %451 = vadd.xlane.f32.xlu2 %v450_v27  ;;  %v117_v26 = vld [vmem:[#allocation8 + $0x8] sm:$0xff]  ;;  %v116_v27 = vld [vmem:[#allocation8] sm:$0xff] }
 0x298   :  { %v416_v28 = vpop.xlane.xlu2 %415 }
 0x299   :  { %v428_v13 = vsub.f32 %v2162_v52, %v416_v28 }
 0x29b   :  { %v441_v43 = vmul.f32 1.442695, %v428_v13 }
 0x29d   :  { %v1756_v29 = vpop.eup %1755 }
 0x29e   :  { %v453_v30 = vsel %vm184_vm1, %v1756_v29, 0.0  ;;  %v449_v34 = vpop.xlane.xlu0 %448 }
 0x29f   :  { %454 = vadd.xlane.f32.xlu1 %v453_v30 }
 0x2a0   :  { %v419_v31 = vpop.xlane.xlu2 %418 }
 0x2a1   :  { %v429_v32 = vsub.f32 %v397_v56, %v419_v31 }
 0x2a3   :  { %v443_v33 = vmul.f32 1.442695, %v429_v32 }
 0x2a5   :  { %1757 = vpow2.f32 %v443_v33 }
 0x2a6   :  { %1759 = vrcp.f32 %v449_v34 }
 0x2a7   :  { %1761 = vpow2.f32 %v441_v43 }
 0x2ab   :  { %v1758_v35 = vpop.eup %1757 }
 0x2ac   :  { %v465_v36 = vsel %vm184_vm1, %v1758_v35, 0.0  ;;  %v1760_v38 = vpop.eup %1759 }
 0x2ad   :  { %466 = vadd.xlane.f32.xlu1 %v465_v36  ;;  %v479_v42 = vmul.f32 %v1760_v38, %v1746_v55  ;;  %v1762_v44 = vpop.eup %1761 }
 0x2ae   :  { %v462_v45 = vsel %vm184_vm1, %v1762_v44, 0.0 }
 0x2af   :  { %1715 = vrot.lane.b32.xlu2 %v1714_v37, %s1986_s24 }
 0x2b1   :  { %v1706_v39 = vpop.permute.xlu0 %1705 }
 0x2b2   :  { %v1708_v40 = vunpack.i.h.bf16 %v1706_v39  ;;  %v1707_v41 = vunpack.i.l.bf16 %v1706_v39 }
 0x2b4   :  { %508 = vmatpush.msrb.mxu3 %v1707_v41  ;;  %560 = vmatpush.msra.mxu1 %v1708_v40  ;;  %v2221_v40 = vld [vmem:[#allocation10] sm:$0xff] }
 0x2b5   :  { %1646 = vmatmul.msk.f32.vlgmr.msrb.gmra.mxu3 %vm184_vm1, %v479_v42  ;;  %v727_v41 = vperm.slane %v2221_v40, 0 }
 0x2b7   :  { %669 = vrot.lane.b32.xlu2 %v2100_v15, %s1986_s24 }
 0x2bf   :  { %617 = vrot.lane.b32.xlu2 %v2113_v18, %s1986_s24 }
 0x2c6   :  { %1710 = vrot.lane.b32.xlu1 %v1709_v11, %s1986_s24 }
 0x2f0   :  { %463 = vadd.xlane.f32.xlu1 %v462_v45 }
 0x2f1   :  { %v461_v46 = vpop.xlane.xlu2 %460 }
 0x2f9   :  { %v470_v48 = vpop.xlane.xlu0 %469 }
 0x302   :  { %v458_v47 = vpop.xlane.xlu2 %457 }
 0x303   :  { %1763 = vrcp.f32 %v458_v47 }
 0x309   :  { %v1764_v18 = vpop.eup %1763 }
 0x30a   :  { %v452_v15 = vpop.xlane.xlu2 %451  ;;  %v482_v52 = vmul.f32 %v1764_v18, %v1752_v20 }
 0x30b   :  { %1765 = vrcp.f32 %v452_v15  ;;  %v1989_v15 = vmov 32.0  }
 0x30c   :  { %1767 = vrcp.f32 %v470_v48 }
 0x311   :  { %v1766_v49 = vpop.eup %1765 }
 0x312   :  { %v1716_v14 = vpop.permute.xlu2 %1715  ;;  %v455_v16 = vpop.xlane.xlu1 %454  ;;  %v480_v53 = vmul.f32 %v1766_v49, %v1754_v25  ;;  %v118_v25 = vld [vmem:[#allocation8 + $0x10] sm:$0xff] }
 0x313   :  { %v1718_v50 = vunpack.i.h.bf16 %v1716_v14  ;;  %v1717_v51 = vunpack.i.l.bf16 %v1716_v14  ;;  %1769 = vrcp.f32 %v455_v16  ;;  %v1768_v54 = vpop.eup %1767 }
 0x314   :  { %v486_v58 = vmul.f32 %v1768_v54, %v2177_v9  ;;  %1771 = vrcp.f32 %v461_v46  ;;  %v113_v54 = vld [vmem:[#allocation7 + $0x30] sm:$0xff] }
 0x315   :  { %534 = vmatpush.msra.mxu0 %v1718_v50  ;;  %586 = vmatpush.msra.mxu2 %v1717_v51 }
 0x316   :  { %1647 = vmatmul.msk.f32.vlgmr.msra.gmra.mxu0 %vm184_vm1, %v480_v53  ;;  %1649 = vmatmul.msk.f32.vlgmr.msra.gmra.mxu2 %vm184_vm1, %v482_v52 }
 0x319   :  { %v1770_v55 = vpop.eup %1769 }
 0x31a   :  { %v481_v56 = vmul.f32 %v1770_v55, %v1756_v29  ;;  %v670_v57 = vpop.permute.xlu2 %669  ;;  %v1772_v61 = vpop.eup %1771  ;;  %v114_v55 = vld [vmem:[#allocation7 + $0x38] sm:$0xff] }
 0x31b   :  { %690 = vmatpush.msrb.mxu2 %v670_v57  ;;  %v483_v3 = vmul.f32 %v1772_v61, %v2173_v1  ;;  %v112_v57 = vld [vmem:[#allocation7 + $0x28] sm:$0xff] }
 0x31c   :  { %1648 = vmatmul.msk.f32.vlgmr.msra.gmra.mxu1 %vm184_vm1, %v481_v56  ;;  %v1719_v56 = vpack.i.bf16 %v113_v54, %v114_v55 }
 0x31e   :  { %1653 = vmatmul.msk.f32.vlgmr.msrb.gmra.mxu2 %vm184_vm1, %v486_v58  ;;  %v111_v58 = vld [vmem:[#allocation7 + $0x20] sm:$0xff] }
 0x320   :  { %v467_v60 = vpop.xlane.xlu1 %466 }
 0x321   :  { %1773 = vrcp.f32 %v467_v60 }
 0x322   :  { %v618_v59 = vpop.permute.xlu2 %617 }
 0x323   :  { %638 = vmatpush.msrb.mxu0 %v618_v59 }
 0x325   :  { %835 = vmatpush.msra.mxu0 %v114_v55 }
 0x327   :  { %v1774_v62 = vpop.eup %1773  ;;  %836 = vmatpush.msra.mxu0 %v113_v54 }
 0x328   :  { %v485_v7 = vmul.f32 %v1774_v62, %v1758_v35 }
 0x329   :  { %837 = vmatpush.msra.mxu0 %v112_v57 }
 0x32b   :  { %838 = vmatpush.msra.mxu0 %v111_v58 }
 0x338   :  { %v1711_v63 = vpop.permute.xlu1 %1710  ;;  %v510_v19 = vpop.f32.mrf.mxu3 }
 0x339   :  { %v1713_v0 = vunpack.i.h.bf16 %v1711_v63  ;;  %v1712_v2 = vunpack.i.l.bf16 %v1711_v63 }
 0x33b   :  { %612 = vmatpush.msra.mxu3 %v1712_v2  ;;  %664 = vmatpush.msrb.mxu1 %v1713_v0  ;;  %v1724_v0 = vpack.i.bf16 %v111_v58, %v112_v57 }
 0x33c   :  { %1650 = vmatmul.msk.f32.vlgmr.msra.gmra.mxu3 %vm184_vm1, %v483_v3  ;;  %1652 = vmatmul.msk.f32.vlgmr.msrb.gmra.mxu1 %vm184_vm1, %v485_v7 }
 0x33d   :  { %746 = vmatpush.msrb.mxu3 %v119_v24 }
 0x33f   :  { %747 = vmatpush.msrb.mxu3 %v118_v25  ;;  %v813_v25 = vperm.slane %v2221_v40, 2 }
 0x341   :  { %748 = vmatpush.msrb.mxu3 %v117_v26 }
 0x343   :  { %749 = vmatpush.msrb.mxu3 %v116_v27  ;;  %v816_v27 = vperm.slane %v2067_v6, 1 }
 0x363   :  { %v464_v8 = vpop.xlane.xlu1 %463 }
 0x364   :  { %1775 = vrcp.f32 %v464_v8 }
 0x365   :  { %1777 = vrcp.f32 %v1989_v15 }
 0x36a   :  { %v1776_v9 = vpop.eup %1775 }
 0x36b   :  { %v484_v10 = vmul.f32 %v1776_v9, %v1762_v44  ;;  %v1778_v48 = vpop.eup %1777 }
 0x36c   :  { %v766_v18 = vmul.f32 32.0, %v1778_v48  ;;  %vm770_vm5 = vweird.f32 %v1778_v48 }
 0x36d   :  { %1651 = vmatmul.msk.f32.vlgmr.msrb.gmra.mxu0 %vm184_vm1, %v484_v10 }
 0x36e   :  { %v767_v49 = vsub.f32 1.0, %v766_v18 }
 0x370   :  { %v768_v14 = vmul.f32 %v1778_v48, %v767_v49 }
 0x372   :  { %v769_v16 = vadd.f32 %v1778_v48, %v768_v14 }
 0x374   :  { %v2228_v50 = vsel %vm770_vm5, %v1778_v48, %v769_v16 }
 0x393   :  { %v536_v22 = vpop.f32.mrf.mxu0 }
 0x399   :  { %v562_v12 = vpop.f32.mrf.mxu1  ;;  %v588_v17 = vpop.f32.mrf.mxu2 }
 0x39a   :  { %699 = vrot.lane.b32.xlu1 %v588_v17, %s1977_s30  ;;  %697 = vrot.lane.b32.xlu0 %v562_v12, %s1977_s30 }
 0x3a1   :  { %v692_v1 = vpop.f32.mrf.mxu2 }
 0x3a2   :  { %715 = vrot.lane.b32.xlu0 %v692_v1, %s1987_s25 }
 0x3b9   :  { %v666_v21 = vpop.f32.mrf.mxu1 }
 0x3bf   :  { %v614_v20 = vpop.f32.mrf.mxu3 }
 0x3c0   :  { %705 = vrot.lane.b32.xlu2 %v614_v20, %s1988_s26 }
 0x3c8   :  { %713 = vrot.lane.b32.xlu2 %v666_v21, %s1987_s25 }
 0x3ea   :  { %v640_v23 = vpop.f32.mrf.mxu0 }
 0x3eb   :  { %707 = vrot.lane.b32.xlu2 %v640_v23, %s1988_s26 }
 0x40c   :  { %v698_v29 = vpop.permute.xlu0 %697  ;;  %v700_v34 = vpop.permute.xlu1 %699 }
 0x40d   :  { %v719_v30 = vsel %vm184_vm1, %v510_v19, %v698_v29  ;;  %v720_v35 = vsel %vm184_vm1, %v536_v22, %v700_v34  ;;  %v810_v22 = vperm.slane %v2221_v40, 1 }
 0x414   :  { %v716_v37 = vpop.permute.xlu0 %715 }
 0x41a   :  { %v706_v28 = vpop.permute.xlu2 %705 }
 0x41b   :  { %v722_v31 = vsel %vm721_vm3, %v719_v30, %v706_v28 }
 0x422   :  { %v714_v32 = vpop.permute.xlu2 %713 }
 0x423   :  { %v725_v33 = vsel %vm724_vm4, %v722_v31, %v714_v32 }
 0x424   :  { %1654 = vmatmul.msk.f32.vlgmr.msrb.gmra.mxu3 %vm138_vm0, %v725_v33 }
 0x445   :  { %v708_v36 = vpop.permute.xlu2 %707 }
 0x446   :  { %v723_v38 = vsel %vm721_vm3, %v720_v35, %v708_v36  ;;  %v104_v36 = vld [vmem:[#allocation5] sm:$0xff] }
 0x447   :  { %v726_v39 = vsel %vm724_vm4, %v723_v38, %v716_v37 }
 0x448   :  { %1655 = vmatmul.msk.f32.gmra.mxu3 %vm138_vm0, %v726_v39 }
 0x4a7   :  { %v751_v42 = vpop.f32.mrf.mxu3 }
 0x4a8   :  { %v752_v11 = vadd.f32 %v751_v42, %v727_v41 }
 0x4aa   :  { %v757_v13 = vadd.f32 %v752_v11, %v2056_v4 }
 0x4ac   :  { %v759_v43 = vsel %vm138_vm0, %v757_v13, 0.0 }
 0x4ad   :  { %760 = vadd.xlane.f32.xlu2 %v759_v43 }
 0x4cb   :  { %v754_v44 = vpop.f32.mrf.mxu3 }
 0x4cc   :  { %v755_v45 = vadd.f32 %v754_v44, %v727_v41  ;;  %v105_v41 = vld [vmem:[#allocation5 + $0x8] sm:$0xff] }
 0x4ce   :  { %v758_v46 = vadd.f32 %v755_v45, %v2060_v5 }
 0x4d0   :  { %v762_v47 = vsel %vm138_vm0, %v758_v46, 0.0 }
 0x4d1   :  { %763 = vadd.xlane.f32.xlu0 %v762_v47 }
 0x4e5   :  { %1720 = vrot.lane.b32.xlu0 %v1719_v56, %s1985_s23 }
 0x520   :  { %v761_v4 = vpop.xlane.xlu2 %760 }
 0x521   :  { %v772_v51 = vmul.f32 %v2228_v50, %v761_v4 }
 0x523   :  { %v774_v52 = vsub.f32 %v757_v13, %v772_v51 }
 0x525   :  { %v776_v53 = vmul.f32 %v774_v52, %v774_v52 }
 0x527   :  { %v778_v5 = vsel %vm138_vm0, %v776_v53, 0.0 }
 0x528   :  { %779 = vadd.xlane.f32.xlu1 %v778_v5 }
 0x541   :  { %863 = vrot.lane.b32.xlu1 %v816_v27, %s1985_s23 }
 0x544   :  { %v764_v59 = vpop.xlane.xlu0 %763 }
 0x545   :  { %v773_v60 = vmul.f32 %v2228_v50, %v764_v59 }
 0x547   :  { %v775_v61 = vsub.f32 %v758_v46, %v773_v60 }
 0x549   :  { %v777_v62 = vmul.f32 %v775_v61, %v775_v61 }
 0x54b   :  { %v781_v63 = vsel %vm138_vm0, %v777_v62, 0.0 }
 0x54c   :  { %782 = vadd.xlane.f32.xlu2 %v781_v63 }
 0x557   :  { %v1721_v8 = vpop.permute.xlu0 %1720 }
 0x558   :  { %v1722_v9 = vunpack.i.l.bf16 %v1721_v8  ;;  %v1723_v10 = vunpack.i.h.bf16 %v1721_v8 }
 0x55a   :  { %884 = vmatpush.msra.mxu1 %v1722_v9 }
 0x55c   :  { %885 = vmatpush.msra.mxu1 %v1723_v10 }
 0x564   :  { %1725 = vrot.lane.b32.xlu2 %v1724_v0, %s1985_s23 }
 0x59b   :  { %v780_v2 = vpop.xlane.xlu1 %779 }
 0x59c   :  { %v784_v3 = vmul.f32 %v780_v2, %v2228_v50 }
 0x59e   :  { %v786_v7 = vadd.f32 1e-05, %v784_v3 }
 0x5a0   :  { %1779 = vrsqrt.f32 %v786_v7  ;;  %vm794_vm7 = vweird.f32 %v786_v7 }
 0x5a6   :  { %v1780_v12 = vpop.eup %1779 }
 0x5a7   :  { %v789_v17 = vmul.f32 %v1780_v12, %v786_v7  ;;  %vm795_vm6 = vweird.f32 %v1780_v12 }
 0x5a8   :  { %vm796_vm8 = vmor %vm794_vm7, %vm795_vm6 }
 0x5a9   :  { %v790_v1 = vmul.f32 %v1780_v12, %v789_v17 }
 0x5ab   :  { %v791_v19 = vmul.f32 0.5, %v790_v1 }
 0x5ad   :  { %v792_v20 = vsub.f32 1.5, %v791_v19 }
 0x5af   :  { %v793_v21 = vmul.f32 %v1780_v12, %v792_v20 }
 0x5b1   :  { %v797_v23 = vsel %vm796_vm8, %v1780_v12, %v793_v21 }
 0x5b2   :  { %v808_v24 = vmul.f32 %v797_v23, %v774_v52 }
 0x5b3   :  { %v864_v47 = vpop.permute.xlu1 %863 }
 0x5b4   :  { %v811_v26 = vmul.f32 %v810_v22, %v808_v24 }
 0x5b6   :  { %v2240_v28 = vadd.f32 %v813_v25, %v811_v26 }
 0x5b8   :  { %1656 = vmatmul.msk.f32.vlgmr.msra.gmra.mxu0 %vm138_vm0, %v2240_v28 }
 0x5bf   :  { %v783_v29 = vpop.xlane.xlu2 %782 }
 0x5c0   :  { %v785_v30 = vmul.f32 %v783_v29, %v2228_v50 }
 0x5c2   :  { %v787_v31 = vadd.f32 1e-05, %v785_v30 }
 0x5c4   :  { %1781 = vrsqrt.f32 %v787_v31  ;;  %vm804_vm10 = vweird.f32 %v787_v31 }
 0x5c7   :  { %v1726_v32 = vpop.permute.xlu2 %1725 }
 0x5c8   :  { %v1727_v33 = vunpack.i.l.bf16 %v1726_v32  ;;  %v1728_v35 = vunpack.i.h.bf16 %v1726_v32 }
 0x5ca   :  { %v1782_v34 = vpop.eup %1781  ;;  %886 = vmatpush.msra.mxu1 %v1727_v33 }
 0x5cb   :  { %v799_v37 = vmul.f32 %v1782_v34, %v787_v31  ;;  %vm805_vm9 = vweird.f32 %v1782_v34 }
 0x5cc   :  { %887 = vmatpush.msra.mxu1 %v1728_v35  ;;  %vm806_vm11 = vmor %vm804_vm10, %vm805_vm9 }
 0x5cd   :  { %v800_v6 = vmul.f32 %v1782_v34, %v799_v37  ;;  %1658 = vmatmul.msk.f32.vlgmr.msra.gmra.mxu1 %vm138_vm0, %v104_v36 }
 0x5cf   :  { %v801_v38 = vmul.f32 0.5, %v800_v6 }
 0x5d1   :  { %v802_v39 = vsub.f32 1.5, %v801_v38 }
 0x5d3   :  { %v803_v42 = vmul.f32 %v1782_v34, %v802_v39 }
 0x5d5   :  { %v807_v11 = vsel %vm806_vm11, %v1782_v34, %v803_v42  ;;  %1659 = vmatmul.msk.f32.gmra.mxu1 %vm138_vm0, %v105_v41 }
 0x5d6   :  { %v809_v13 = vmul.f32 %v807_v11, %v775_v61 }
 0x5d8   :  { %v812_v43 = vmul.f32 %v810_v22, %v809_v13 }
 0x5da   :  { %v2248_v44 = vadd.f32 %v813_v25, %v812_v43 }
 0x5dc   :  { %1657 = vmatmul.msk.f32.gmra.mxu0 %vm138_vm0, %v2248_v44 }
 0x635   :  { %v840_v45 = vpop.f32.mrf.mxu0 }
 0x636   :  { %v841_v46 = vadd.f32 %v840_v45, %v816_v27 }
 0x638   :  { %905 = vrot.lane.b32.xlu1 %v841_v46, %s1983_s22 }
 0x64a   :  { %v889_v15 = vpop.f32.mrf.mxu1 }
 0x64b   :  { %v2253_v48 = vadd.f32 %v889_v15, %v864_v47 }
 0x64d   :  { %915 = vrot.lane.b32.xlu1 %v2253_v48, %s1984_s3  ;;  %919 = vrot.lane.b32.xlu2 %v2253_v48, %s1983_s22 }
 0x64e   :  { %911 = vrot.lane.b32.xlu0 %v2253_v48, %s1982_s21  ;;  %1660 = vmatpush.xpose.msk.msra.mxu2 %vm184_vm1, %v2253_v48 }
 0x651   :  { %1661 = vmatmul.msk.f32.vlgmr.msra.gmra.mxu2 %vm184_vm1, %v841_v46 }
 0x652   :  { %v892_v18 = vpop.f32.mrf.mxu1 }
 0x653   :  { %v2264_v49 = vadd.f32 %v892_v18, %v864_v47 }
 0x655   :  { %1662 = vmatpush.xpose.msk.msrb.mxu2 %vm184_vm1, %v2264_v49 }
 0x656   :  { %897 = vrot.lane.b32.xlu0 %v841_v46, %s1982_s21 }
 0x659   :  { %v843_v14 = vpop.f32.mrf.mxu0 }
 0x65a   :  { %v844_v16 = vadd.f32 %v843_v14, %v816_v27 }
 0x65c   :  { %899 = vrot.lane.b32.xlu1 %v844_v16, %s1982_s21  ;;  %903 = vrot.lane.b32.xlu2 %v844_v16, %s1984_s3 }
 0x65d   :  { %1663 = vmatmul.msk.f32.vlgmr.msrb.gmra.mxu2 %vm184_vm1, %v844_v16 }
 0x65e   :  { %917 = vrot.lane.b32.xlu0 %v2264_v49, %s1984_s3 }
 0x664   :  { %901 = vrot.lane.b32.xlu2 %v841_v46, %s1984_s3 }
 0x666   :  { %913 = vrot.lane.b32.xlu0 %v2264_v49, %s1982_s21 }
 0x66c   :  { %907 = vrot.lane.b32.xlu2 %v844_v16, %s1983_s22 }
 0x66e   :  { %921 = vrot.lane.b32.xlu0 %v2264_v49, %s1983_s22 }
 0x6a7   :  { %v920_v4 = vpop.permute.xlu2 %919 }
 0x6a8   :  { %v1734_v29 = vpack.i.bf16 %v920_v4, %v2264_v49 }
 0x6aa   :  { %v906_v51 = vpop.permute.xlu1 %905 }
 0x6b6   :  { %v904_v52 = vpop.permute.xlu2 %903 }
 0x6be   :  { %v902_v54 = vpop.permute.xlu2 %901 }
 0x6bf   :  { %v2280_v53 = vpop.permute.xlu1 %915 }
 0x6c0   :  { %v912_v5 = vpop.permute.xlu0 %911  ;;  %1668 = vmatpush.xpose.msk.msrb.mxu1 %vm184_vm1, %v2280_v53 }
 0x6c1   :  { %1664 = vmatpush.xpose.msk.msra.mxu3 %vm184_vm1, %v912_v5  ;;  %v1729_v30 = vpack.i.bf16 %v2253_v48, %v912_v5 }
 0x6c3   :  { %1669 = vmatmul.msk.f32.vlgmr.msrb.gmra.mxu1 %vm184_vm1, %v902_v54 }
 0x6c5   :  { %1672 = vmatpush.xpose.msk.msrb.mxu3 %vm184_vm1, %v920_v4 }
 0x6c6   :  { %v908_v2 = vpop.permute.xlu2 %907 }
 0x6c8   :  { %v898_v55 = vpop.permute.xlu0 %897 }
 0x6c9   :  { %1665 = vmatmul.msk.f32.vlgmr.msra.gmra.mxu3 %vm184_vm1, %v898_v55 }
 0x6ce   :  { %v900_v61 = vpop.permute.xlu1 %899 }
 0x6d0   :  { %v918_v56 = vpop.permute.xlu0 %917 }
 0x6d1   :  { %1670 = vmatpush.xpose.msk.msra.mxu2 %vm184_vm1, %v918_v56  ;;  %1673 = vmatmul.msk.f32.vlgmr.msrb.gmra.mxu3 %vm184_vm1, %v906_v51 }
 0x6d4   :  { %v944_v57 = vpop.f32.mrf.mxu2  ;;  %1671 = vmatmul.msk.f32.vlgmr.msra.gmra.mxu2 %vm184_vm1, %v904_v52 }
 0x6d5   :  { %v1115_v58 = vsel %vm184_vm1, %v944_v57, -inf }
 0x6d6   :  { %1116 = vmax.xlane.f32.xlu0 %v1115_v58 }
 0x6d8   :  { %v2292_v59 = vpop.permute.xlu0 %913 }
 0x6d9   :  { %v1739_v60 = vpack.i.bf16 %v2292_v59, %v2280_v53  ;;  %1666 = vmatpush.xpose.msk.msrb.mxu0 %vm184_vm1, %v2292_v59 }
 0x6dc   :  { %1667 = vmatmul.msk.f32.vlgmr.msrb.gmra.mxu0 %vm184_vm1, %v900_v61 }
 0x6e0   :  { %v2299_v62 = vpop.permute.xlu0 %921  ;;  %v968_v63 = vpop.f32.mrf.mxu2 }
 0x6e1   :  { %1674 = vmatpush.xpose.msk.msra.mxu0 %vm184_vm1, %v2299_v62  ;;  %v1118_v0 = vsel %vm184_vm1, %v968_v63, -inf }
 0x6e2   :  { %1119 = vmax.xlane.f32.xlu2 %v1118_v0 }
 0x6e4   :  { %1675 = vmatmul.msk.f32.vlgmr.msra.gmra.mxu0 %vm184_vm1, %v908_v2 }
 0x740   :  { %v1040_v3 = vpop.f32.mrf.mxu1 }
 0x741   :  { %v1127_v7 = vsel %vm184_vm1, %v1040_v3, -inf }
 0x742   :  { %1128 = vmax.xlane.f32.xlu2 %v1127_v7 }
 0x749   :  { %v1117_v31 = vpop.xlane.xlu0 %1116 }
 0x74a   :  { %v1139_v32 = vsub.f32 %v944_v57, %v1117_v31 }
 0x74c   :  { %v992_v8 = vpop.f32.mrf.mxu3  ;;  %v1147_v33 = vmul.f32 1.442695, %v1139_v32 }
 0x74d   :  { %v1121_v9 = vsel %vm184_vm1, %v992_v8, -inf }
 0x74e   :  { %1122 = vmax.xlane.f32.xlu1 %v1121_v9 }
 0x754   :  { %v1088_v10 = vpop.f32.mrf.mxu3 }
 0x755   :  { %v1133_v12 = vsel %vm184_vm1, %v1088_v10, -inf  ;;  %v1120_v17 = vpop.xlane.xlu2 %1119 }
 0x756   :  { %1134 = vmax.xlane.f32.xlu1 %v1133_v12  ;;  %v1140_v1 = vsub.f32 %v968_v63, %v1120_v17 }
 0x757   :  { %v1064_v20 = vpop.f32.mrf.mxu2 }
 0x758   :  { %v1149_v22 = vmul.f32 1.442695, %v1140_v1  ;;  %v1130_v23 = vsel %vm184_vm1, %v1064_v20, -inf }
 0x759   :  { %v1016_v19 = vpop.f32.mrf.mxu0 }
 0x75a   :  { %v1124_v21 = vsel %vm184_vm1, %v1016_v19, -inf  ;;  %1783 = vpow2.f32 %v1149_v22 }
 0x75b   :  { %1125 = vmax.xlane.f32.xlu0 %v1124_v21  ;;  %1785 = vpow2.f32 %v1147_v33 }
 0x75e   :  { %1131 = vmax.xlane.f32.xlu1 %v1130_v23 }
 0x760   :  { %v1784_v26 = vpop.eup %1783 }
 0x761   :  { %v1112_v24 = vpop.f32.mrf.mxu0  ;;  %v1166_v27 = vsel %vm184_vm1, %v1784_v26, 0.0  ;;  %v2316_v34 = vpop.eup %1785 }
 0x762   :  { %v1136_v25 = vsel %vm184_vm1, %v1112_v24, -inf  ;;  %v1163_v35 = vsel %vm184_vm1, %v2316_v34, 0.0 }
 0x763   :  { %1137 = vmax.xlane.f32.xlu2 %v1136_v25 }
 0x76b   :  { %1167 = vadd.xlane.f32.xlu2 %v1166_v27 }
 0x76f   :  { %1735 = vrot.lane.b32.xlu0 %v1734_v29, %s1985_s23 }
 0x777   :  { %1730 = vrot.lane.b32.xlu1 %v1729_v30, %s1985_s23 }
 0x7a1   :  { %1164 = vadd.xlane.f32.xlu1 %v1163_v35 }
 0x7b5   :  { %v1129_v36 = vpop.xlane.xlu2 %1128 }
 0x7b6   :  { %v1143_v37 = vsub.f32 %v1040_v3, %v1129_v36 }
 0x7b8   :  { %v1155_v6 = vmul.f32 1.442695, %v1143_v37 }
 0x7ba   :  { %1787 = vpow2.f32 %v1155_v6  ;;  %1333 = vrot.lane.b32.xlu1 %v918_v56, %s1985_s23 }
 0x7c0   :  { %v2321_v38 = vpop.eup %1787 }
 0x7c1   :  { %v1123_v39 = vpop.xlane.xlu1 %1122  ;;  %v1175_v41 = vsel %vm184_vm1, %v2321_v38, 0.0 }
 0x7c2   :  { %v1141_v42 = vsub.f32 %v992_v8, %v1123_v39  ;;  %1176 = vadd.xlane.f32.xlu2 %v1175_v41 }
 0x7c4   :  { %v1151_v11 = vmul.f32 1.442695, %v1141_v42 }
 0x7c6   :  { %1789 = vpow2.f32 %v1151_v11 }
 0x7c9   :  { %v1135_v13 = vpop.xlane.xlu1 %1134 }
 0x7ca   :  { %v1145_v15 = vsub.f32 %v1088_v10, %v1135_v13 }
 0x7cc   :  { %v1790_v43 = vpop.eup %1789  ;;  %v1159_v16 = vmul.f32 1.442695, %v1145_v15  ;;  %v124_v15 = vld [vmem:[#allocation8 + $0x38] sm:$0xff] }
 0x7cd   :  { %v1169_v45 = vsel %vm184_vm1, %v1790_v43, 0.0 }
 0x7ce   :  { %1170 = vadd.xlane.f32.xlu0 %v1169_v45  ;;  %v1126_v46 = vpop.xlane.xlu0 %1125 }
 0x7cf   :  { %v1142_v47 = vsub.f32 %v1016_v19, %v1126_v46 }
 0x7d1   :  { %v1153_v48 = vmul.f32 1.442695, %v1142_v47  ;;  %v1132_v18 = vpop.xlane.xlu1 %1131 }
 0x7d2   :  { %v1144_v49 = vsub.f32 %v1064_v20, %v1132_v18  ;;  %v122_v18 = vld [vmem:[#allocation8 + $0x28] sm:$0xff] }
 0x7d3   :  { %1791 = vpow2.f32 %v1153_v48  ;;  %v123_v48 = vld [vmem:[#allocation8 + $0x30] sm:$0xff] }
 0x7d4   :  { %v1157_v14 = vmul.f32 1.442695, %v1144_v49  ;;  %v121_v49 = vld [vmem:[#allocation8 + $0x20] sm:$0xff] }
 0x7d6   :  { %1793 = vpow2.f32 %v1157_v14  ;;  %v1138_v4 = vpop.xlane.xlu2 %1137 }
 0x7d7   :  { %v1146_v51 = vsub.f32 %v1112_v24, %v1138_v4  ;;  %1795 = vpow2.f32 %v1159_v16 }
 0x7d9   :  { %v2326_v52 = vpop.eup %1791  ;;  %v1161_v5 = vmul.f32 1.442695, %v1146_v51 }
 0x7da   :  { %v1172_v54 = vsel %vm184_vm1, %v2326_v52, 0.0 }
 0x7db   :  { %1173 = vadd.xlane.f32.xlu0 %v1172_v54  ;;  %1797 = vpow2.f32 %v1161_v5 }
 0x7dc   :  { %v1794_v55 = vpop.eup %1793 }
 0x7dd   :  { %v1178_v56 = vsel %vm184_vm1, %v1794_v55, 0.0  ;;  %v1796_v58 = vpop.eup %1795 }
 0x7de   :  { %v1168_v57 = vpop.xlane.xlu2 %1167  ;;  %1179 = vadd.xlane.f32.xlu2 %v1178_v56  ;;  %v1181_v2 = vsel %vm184_vm1, %v1796_v58, 0.0 }
 0x7df   :  { %1799 = vrcp.f32 %v1168_v57 }
 0x7e1   :  { %v1736_v61 = vpop.permute.xlu0 %1735  ;;  %v1798_v63 = vpop.eup %1797 }
 0x7e2   :  { %v1737_v0 = vunpack.i.l.bf16 %v1736_v61  ;;  %v1184_v7 = vsel %vm184_vm1, %v1798_v63, 0.0  ;;  %v1738_v17 = vunpack.i.h.bf16 %v1736_v61 }
 0x7e3   :  { %1182 = vadd.xlane.f32.xlu0 %v1181_v2 }
 0x7e4   :  { %1250 = vmatpush.msrb.mxu2 %v1737_v0 }
 0x7e5   :  { %v1800_v3 = vpop.eup %1799 }
 0x7e6   :  { %v1196_v8 = vmul.f32 %v1800_v3, %v1784_v26  ;;  %1185 = vadd.xlane.f32.xlu2 %v1184_v7 }
 0x7e8   :  { %1677 = vmatmul.msk.f32.vlgmr.msrb.gmra.mxu2 %vm184_vm1, %v1196_v8 }
 0x7e9   :  { %v1731_v9 = vpop.permute.xlu1 %1730 }
 0x7ea   :  { %v1733_v10 = vunpack.i.h.bf16 %v1731_v9  ;;  %v1732_v12 = vunpack.i.l.bf16 %v1731_v9 }
 0x7ec   :  { %1224 = vmatpush.msra.mxu1 %v1733_v10  ;;  %1276 = vmatpush.msra.mxu3 %v1732_v12 }
 0x7ee   :  { %1380 = vmatpush.msrb.mxu3 %v1738_v17 }
 0x7f7   :  { %1385 = vrot.lane.b32.xlu0 %v2299_v62, %s1985_s23 }
 0x7fe   :  { %1740 = vrot.lane.b32.xlu2 %v1739_v60, %s1985_s23 }
 0x814   :  { %v1165_v1 = vpop.xlane.xlu1 %1164 }
 0x815   :  { %1801 = vrcp.f32 %v1165_v1 }
 0x81b   :  { %v1802_v19 = vpop.eup %1801 }
 0x81c   :  { %v1195_v20 = vmul.f32 %v1802_v19, %v2316_v34 }
 0x81e   :  { %1676 = vmatmul.msk.f32.vlgmr.msra.gmra.mxu1 %vm184_vm1, %v1195_v20 }
 0x82c   :  { %v1334_v21 = vpop.permute.xlu1 %1333 }
 0x82d   :  { %1354 = vmatpush.msra.mxu2 %v1334_v21 }
 0x835   :  { %v1177_v24 = vpop.xlane.xlu2 %1176 }
 0x841   :  { %v1171_v22 = vpop.xlane.xlu0 %1170 }
 0x842   :  { %1803 = vrcp.f32 %v1171_v22 }
 0x848   :  { %v1804_v23 = vpop.eup %1803 }
 0x849   :  { %v1197_v25 = vmul.f32 %v1804_v23, %v1790_v43 }
 0x84b   :  { %1678 = vmatmul.msk.f32.vlgmr.msra.gmra.mxu3 %vm184_vm1, %v1197_v25 }
 0x84e   :  { %v1174_v62 = vpop.xlane.xlu0 %1173 }
 0x851   :  { %v1180_v26 = vpop.xlane.xlu2 %1179 }
 0x852   :  { %1805 = vrcp.f32 %v1180_v26  ;;  %v127_v26 = vld [vmem:[#allocation8 + $0x48] sm:$0xff] }
 0x856   :  { %v1183_v53 = vpop.xlane.xlu0 %1182 }
 0x857   :  { %1807 = vrcp.f32 %v1183_v53  ;;  %v126_v53 = vld [vmem:[#allocation8 + $0x40] sm:$0xff] }
 0x858   :  { %v1806_v59 = vpop.eup %1805  ;;  %1809 = vrcp.f32 %v1177_v24 }
 0x859   :  { %v1200_v60 = vmul.f32 %v1806_v59, %v1794_v55  ;;  %v1186_v27 = vpop.xlane.xlu2 %1185  ;;  %1811 = vrcp.f32 %v1174_v62  ;;  %v128_v62 = vld [vmem:[#allocation8 + $0x50] sm:$0xff] }
 0x85a   :  { %1813 = vrcp.f32 %v1186_v27 }
 0x85b   :  { %1681 = vmatmul.msk.f32.vlgmr.msra.gmra.mxu2 %vm184_vm1, %v1200_v60 }
 0x85d   :  { %v1808_v29 = vpop.eup %1807 }
 0x85e   :  { %v1201_v30 = vmul.f32 %v1808_v29, %v1796_v58  ;;  %v1810_v31 = vpop.eup %1809 }
 0x85f   :  { %v1812_v32 = vpop.eup %1811  ;;  %v1199_v36 = vmul.f32 %v1810_v31, %v2321_v38 }
 0x860   :  { %1682 = vmatmul.msk.f32.vlgmr.msrb.gmra.mxu3 %vm184_vm1, %v1201_v30  ;;  %v1198_v37 = vmul.f32 %v1812_v32, %v2326_v52  ;;  %v1814_v6 = vpop.eup %1813 }
 0x861   :  { %v1741_v33 = vpop.permute.xlu2 %1740  ;;  %v1202_v41 = vmul.f32 %v1814_v6, %v1798_v63  ;;  %v1441_v63 = vperm.slane %v2221_v40, 3 }
 0x862   :  { %v1743_v34 = vunpack.i.h.bf16 %v1741_v33  ;;  %v1742_v35 = vunpack.i.l.bf16 %v1741_v33 }
 0x864   :  { %1302 = vmatpush.msrb.mxu0 %v1743_v34  ;;  %1328 = vmatpush.msrb.mxu1 %v1742_v35 }
 0x865   :  { %1679 = vmatmul.msk.f32.vlgmr.msrb.gmra.mxu0 %vm184_vm1, %v1198_v37  ;;  %1680 = vmatmul.msk.f32.vlgmr.msrb.gmra.mxu1 %vm184_vm1, %v1199_v36 }
 0x866   :  { %1460 = vmatpush.msra.mxu1 %v124_v15 }
 0x868   :  { %1461 = vmatpush.msra.mxu1 %v123_v48 }
 0x869   :  { %v1386_v39 = vpop.permute.xlu0 %1385 }
 0x86a   :  { %1406 = vmatpush.msra.mxu0 %v1386_v39  ;;  %1462 = vmatpush.msra.mxu1 %v122_v18  ;;  %v1517_v39 = vperm.slane %v2221_v40, 4 }
 0x86b   :  { %v1252_v11 = vpop.f32.mrf.mxu2 }
 0x86c   :  { %1463 = vmatpush.msra.mxu1 %v121_v49 }
 0x86d   :  { %1683 = vmatmul.msk.f32.vlgmr.msra.gmra.mxu0 %vm184_vm1, %v1202_v41 }
 0x89b   :  { %v1226_v13 = vpop.f32.mrf.mxu1 }
 0x8ce   :  { %v1278_v42 = vpop.f32.mrf.mxu3 }
 0x8cf   :  { %1413 = vrot.lane.b32.xlu1 %v1278_v42, %s1977_s30 }
 0x8de   :  { %v1356_v38 = vpop.f32.mrf.mxu2 }
 0x8df   :  { %1423 = vrot.lane.b32.xlu2 %v1356_v38, %s1988_s26  ;;  %v1520_v38 = vperm.slane %v2221_v40, 5 }
 0x8e2   :  { %v1304_v43 = vpop.f32.mrf.mxu0  ;;  %v1330_v45 = vpop.f32.mrf.mxu1 }
 0x8e3   :  { %1421 = vrot.lane.b32.xlu0 %v1330_v45, %s1988_s26  ;;  %v1382_v46 = vpop.f32.mrf.mxu3 }
 0x8e4   :  { %1429 = vrot.lane.b32.xlu1 %v1382_v46, %s1987_s25 }
 0x8ea   :  { %v1408_v47 = vpop.f32.mrf.mxu0 }
 0x8eb   :  { %1415 = vrot.lane.b32.xlu0 %v1304_v43, %s1977_s30 }
 0x8ec   :  { %1431 = vrot.lane.b32.xlu1 %v1408_v47, %s1987_s25 }
 0x939   :  { %v1424_v55 = vpop.permute.xlu2 %1423 }
 0x941   :  { %v1414_v14 = vpop.permute.xlu1 %1413 }
 0x942   :  { %v1435_v16 = vsel %vm184_vm1, %v1226_v13, %v1414_v14 }
 0x955   :  { %v1422_v4 = vpop.permute.xlu0 %1421 }
 0x956   :  { %v1437_v51 = vsel %vm721_vm3, %v1435_v16, %v1422_v4  ;;  %v1430_v52 = vpop.permute.xlu1 %1429  ;;  %v1523_v16 = vperm.slane %v2221_v40, 6 }
 0x957   :  { %v1439_v5 = vsel %vm724_vm4, %v1437_v51, %v1430_v52 }
 0x958   :  { %1684 = vmatmul.msk.f32.vlgmr.msra.gmra.mxu1 %vm138_vm0, %v1439_v5 }
 0x95d   :  { %v1416_v54 = vpop.permute.xlu0 %1415 }
 0x95e   :  { %v1436_v56 = vsel %vm184_vm1, %v1252_v11, %v1416_v54  ;;  %v1432_v57 = vpop.permute.xlu1 %1431 }
 0x95f   :  { %v1438_v58 = vsel %vm721_vm3, %v1436_v56, %v1424_v55 }
 0x960   :  { %v1440_v61 = vsel %vm724_vm4, %v1438_v58, %v1432_v57 }
 0x961   :  { %1685 = vmatmul.msk.f32.gmra.mxu1 %vm138_vm0, %v1440_v61 }
 0x9d5   :  { %v1465_v0 = vpop.f32.mrf.mxu1 }
 0x9d6   :  { %v1466_v2 = vadd.f32 %v1465_v0, %v1441_v63 }
 0x9d8   :  { %v1471_v3 = vadd.f32 %v1466_v2, %v2240_v28 }
 0x9da   :  { %v1473_v7 = vsel %vm138_vm0, %v1471_v3, 0.0 }
 0x9db   :  { %1474 = vadd.xlane.f32.xlu0 %v1473_v7 }
 0x9de   :  { %v1468_v8 = vpop.f32.mrf.mxu1 }
 0x9df   :  { %v1469_v9 = vadd.f32 %v1468_v8, %v1441_v63 }
 0x9e1   :  { %v1472_v10 = vadd.f32 %v1469_v9, %v2248_v44  ;;  %v129_v44 = vld [vmem:[#allocation8 + $0x58] sm:$0xff] }
 0x9e2   :  { %1542 = vmatpush.msrb.mxu2 %v129_v44 }
 0x9e3   :  { %v1476_v12 = vsel %vm138_vm0, %v1472_v10, 0.0 }
 0x9e4   :  { %1477 = vadd.xlane.f32.xlu2 %v1476_v12  ;;  %1543 = vmatpush.msrb.mxu2 %v128_v62 }
 0x9e6   :  { %1544 = vmatpush.msrb.mxu2 %v127_v26  ;;  %v1599_v26 = vperm.slane %v2221_v40, 7 }
 0x9e8   :  { %1545 = vmatpush.msrb.mxu2 %v126_v53 }
 0xa4e   :  { %v1475_v17 = vpop.xlane.xlu0 %1474 }
 0xa4f   :  { %v1479_v1 = vmul.f32 %v1475_v17, %v2228_v50 }
 0xa51   :  { %v1481_v19 = vsub.f32 %v1471_v3, %v1479_v1 }
 0xa53   :  { %v1483_v20 = vmul.f32 %v1481_v19, %v1481_v19 }
 0xa55   :  { %v1485_v21 = vsel %vm138_vm0, %v1483_v20, 0.0 }
 0xa56   :  { %1486 = vadd.xlane.f32.xlu1 %v1485_v21 }
 0xa57   :  { %v1478_v22 = vpop.xlane.xlu2 %1477 }
 0xa58   :  { %v1480_v28 = vmul.f32 %v1478_v22, %v2228_v50 }
 0xa5a   :  { %v1482_v23 = vsub.f32 %v1472_v10, %v1480_v28 }
 0xa5c   :  { %v1484_v24 = vmul.f32 %v1482_v23, %v1482_v23 }
 0xa5e   :  { %v1488_v25 = vsel %vm138_vm0, %v1484_v24, 0.0 }
 0xa5f   :  { %1489 = vadd.xlane.f32.xlu0 %v1488_v25 }
 0xac9   :  { %v1487_v59 = vpop.xlane.xlu1 %1486 }
 0xaca   :  { %v1491_v60 = vmul.f32 %v1487_v59, %v2228_v50 }
 0xacc   :  { %v1493_v27 = vadd.f32 1e-05, %v1491_v60 }
 0xace   :  { %1815 = vrsqrt.f32 %v1493_v27  ;;  %vm1501_vm13 = vweird.f32 %v1493_v27 }
 0xad2   :  { %v1490_v29 = vpop.xlane.xlu0 %1489 }
 0xad3   :  { %v1492_v30 = vmul.f32 %v1490_v29, %v2228_v50  ;;  %v1744_v29 = vld [vmem:[#allocation10 + $0x8] ss:$0 sm:$0xff] }
 0xad4   :  { %v1816_v31 = vpop.eup %1815 }
 0xad5   :  { %v1496_v32 = vmul.f32 %v1816_v31, %v1493_v27  ;;  %v1494_v33 = vadd.f32 1e-05, %v1492_v30  ;;  %vm1502_vm12 = vweird.f32 %v1816_v31 }
 0xad6   :  { %vm1503_vm14 = vmor %vm1501_vm13, %vm1502_vm12 }
 0xad7   :  { %v1497_v34 = vmul.f32 %v1816_v31, %v1496_v32  ;;  %1817 = vrsqrt.f32 %v1494_v33  ;;  %vm1511_vm1 = vweird.f32 %v1494_v33 }
 0xad9   :  { %v1498_v35 = vmul.f32 0.5, %v1497_v34 }
 0xadb   :  { %v1499_v36 = vsub.f32 1.5, %v1498_v35 }
 0xadd   :  { %v1818_v37 = vpop.eup %1817  ;;  %v1500_v6 = vmul.f32 %v1816_v31, %v1499_v36 }
 0xade   :  { %v1506_v41 = vmul.f32 %v1818_v37, %v1494_v33  ;;  %vm1512_vm15 = vweird.f32 %v1818_v37 }
 0xadf   :  { %v1504_v42 = vsel %vm1503_vm14, %v1816_v31, %v1500_v6  ;;  %vm1513_vm2 = vmor %vm1511_vm1, %vm1512_vm15 }
 0xae0   :  { %v1515_v11 = vmul.f32 %v1504_v42, %v1481_v19  ;;  %v1507_v13 = vmul.f32 %v1818_v37, %v1506_v41 }
 0xae2   :  { %v1518_v43 = vmul.f32 %v1517_v39, %v1515_v11  ;;  %v1508_v45 = vmul.f32 0.5, %v1507_v13 }
 0xae4   :  { %v1509_v46 = vsub.f32 1.5, %v1508_v45  ;;  %v1521_v47 = vadd.f32 %v1520_v38, %v1518_v43 }
 0xae6   :  { %v1510_v15 = vmul.f32 %v1818_v37, %v1509_v46  ;;  %1686 = vmatmul.msk.f32.vlgmr.msrb.gmra.mxu2 %vm138_vm0, %v1521_v47 }
 0xae8   :  { %v1514_v48 = vsel %vm1513_vm2, %v1818_v37, %v1510_v15 }
 0xae9   :  { %v1516_v18 = vmul.f32 %v1514_v48, %v1482_v23 }
 0xaeb   :  { %v1519_v49 = vmul.f32 %v1517_v39, %v1516_v18 }
 0xaed   :  { %v1522_v14 = vadd.f32 %v1520_v38, %v1519_v49 }
 0xaef   :  { %1687 = vmatmul.msk.f32.gmra.mxu2 %vm138_vm0, %v1522_v14 }
 0xb69   :  { %v1547_v4 = vpop.f32.mrf.mxu2 }
 0xb6a   :  { %v1548_v51 = vadd.f32 %v1547_v4, %v1523_v16 }
 0xb6c   :  { %v1553_v52 = vadd.f32 %v1548_v51, %v1521_v47 }
 0xb6e   :  { %v1555_v5 = vsel %vm138_vm0, %v1553_v52, 0.0 }
 0xb6f   :  { %1556 = vadd.xlane.f32.xlu2 %v1555_v5 }
 0xb72   :  { %v1550_v54 = vpop.f32.mrf.mxu2 }
 0xb73   :  { %v1551_v55 = vadd.f32 %v1550_v54, %v1523_v16 }
 0xb75   :  { %v1554_v56 = vadd.f32 %v1551_v55, %v1522_v14 }
 0xb77   :  { %v1558_v57 = vsel %vm138_vm0, %v1554_v56, 0.0 }
 0xb78   :  { %1559 = vadd.xlane.f32.xlu1 %v1558_v57 }
 0xbe2   :  { %v1557_v58 = vpop.xlane.xlu2 %1556 }
 0xbe3   :  { %v1561_v61 = vmul.f32 %v1557_v58, %v2228_v50 }
 0xbe5   :  { %v1563_v63 = vsub.f32 %v1553_v52, %v1561_v61 }
 0xbe7   :  { %v1565_v0 = vmul.f32 %v1563_v63, %v1563_v63 }
 0xbe9   :  { %v1567_v2 = vsel %vm138_vm0, %v1565_v0, 0.0 }
 0xbea   :  { %1568 = vadd.xlane.f32.xlu0 %v1567_v2 }
 0xbeb   :  { %v1560_v3 = vpop.xlane.xlu1 %1559 }
 0xbec   :  { %v1562_v7 = vmul.f32 %v1560_v3, %v2228_v50 }
 0xbee   :  { %v1564_v8 = vsub.f32 %v1554_v56, %v1562_v7 }
 0xbf0   :  { %v1566_v9 = vmul.f32 %v1564_v8, %v1564_v8 }
 0xbf2   :  { %v1570_v10 = vsel %vm138_vm0, %v1566_v9, 0.0 }
 0xbf3   :  { %1571 = vadd.xlane.f32.xlu2 %v1570_v10 }
 0xc5d   :  { %v1569_v12 = vpop.xlane.xlu0 %1568 }
 0xc5e   :  { %v1573_v17 = vmul.f32 %v1569_v12, %v2228_v50 }
 0xc60   :  { %v1575_v1 = vadd.f32 1e-05, %v1573_v17 }
 0xc62   :  { %1819 = vrsqrt.f32 %v1575_v1  ;;  %vm1583_vm4 = vweird.f32 %v1575_v1 }
 0xc66   :  { %v1572_v19 = vpop.xlane.xlu2 %1571 }
 0xc67   :  { %v1574_v20 = vmul.f32 %v1572_v19, %v2228_v50 }
 0xc68   :  { %v1820_v21 = vpop.eup %1819 }
 0xc69   :  { %v1578_v22 = vmul.f32 %v1820_v21, %v1575_v1  ;;  %v1576_v28 = vadd.f32 1e-05, %v1574_v20  ;;  %vm1584_vm3 = vweird.f32 %v1820_v21 }
 0xc6a   :  { %vm1585_vm5 = vmor %vm1583_vm4, %vm1584_vm3 }
 0xc6b   :  { %v1579_v23 = vmul.f32 %v1820_v21, %v1578_v22  ;;  %1821 = vrsqrt.f32 %v1576_v28  ;;  %vm1593_vm7 = vweird.f32 %v1576_v28 }
 0xc6d   :  { %v1580_v24 = vmul.f32 0.5, %v1579_v23 }
 0xc6f   :  { %v1581_v25 = vsub.f32 1.5, %v1580_v24 }
 0xc71   :  { %v1822_v44 = vpop.eup %1821  ;;  %v1582_v62 = vmul.f32 %v1820_v21, %v1581_v25 }
 0xc72   :  { %v1588_v53 = vmul.f32 %v1822_v44, %v1576_v28  ;;  %vm1594_vm6 = vweird.f32 %v1822_v44 }
 0xc73   :  { %v1586_v59 = vsel %vm1585_vm5, %v1820_v21, %v1582_v62  ;;  %vm1595_vm8 = vmor %vm1593_vm7, %vm1594_vm6 }
 0xc74   :  { %v1597_v60 = vmul.f32 %v1586_v59, %v1563_v63  ;;  %v1589_v27 = vmul.f32 %v1822_v44, %v1588_v53 }
 0xc76   :  { %v1600_v50 = vmul.f32 %v1599_v26, %v1597_v60  ;;  %v1590_v30 = vmul.f32 0.5, %v1589_v27 }
 0xc78   :  { %v1591_v31 = vsub.f32 1.5, %v1590_v30  ;;  %v1603_v32 = vadd.f32 %v1744_v29, %v1600_v50 }
 0xc7a   :  { %v1592_v33 = vmul.f32 %v1822_v44, %v1591_v31  ;;  %1605 = vst.msk [vmem:[#allocation11] sm:$0xff] %vm138_vm0, %v1603_v32 }
 0xc7c   :  { %v1596_v34 = vsel %vm1595_vm8, %v1822_v44, %v1592_v33 }
 0xc7d   :  { %v1598_v35 = vmul.f32 %v1596_v34, %v1564_v8 }
 0xc7f   :  { %v1601_v40 = vmul.f32 %v1599_v26, %v1598_v35 }
 0xc81   :  { %v1604_v36 = vadd.f32 %v1744_v29, %v1601_v40 }
 0xc83   :  { %1606 = vst.msk [vmem:[#allocation11 + $0x8] sm:$0xff] %vm138_vm0, %v1604_v36 }
 0xc84   :  { %1619 = dma.vmem_to_hbm [thread:$0]  %s1612_s28, 256, %s1614_s9, [#allocation4], %s1976_s29, %s1976_s29, %s1977_s30  }
 0xc85   :  { %1973 = dma.done.wait [#allocation4], 256  }
 0xc86   :  { %1974 = vsyncadd [#allocation4], 4294967040 }
 0xc87   :  { %1624 = vsyncpa [#allocation3], 1 }
 0xc88   :  { %1625 = vsyncpa [#allocation6], 1 }
 0xc89   :  { %1626 = vsyncpa [#allocation9], 1 }
 0xc8a   :  { %1627 = vsyncpa [#allocation4], 1 }

</bundles_post_ra>
